<compile_context>
chip_gen: v7x
topology: tpu7x:2x2x1
jax: 0.10.0
libtpu: 0.0.40
codegen_flags: <defaults>
</compile_context>

<pallas_src>
import jax
import jax.numpy as jnp
from jax.experimental import pallas as pl
from jax.experimental.pallas import tpu as pltpu

C_IN = 726
C_OUT = 2904

# Padded (hardware friendly) sizes used inside the kernel.
C_IN_PAD = 728     # multiple of 8 (sublane dim of weight block / lane dim of x)
C_OUT_PAD = 3072   # 24 * 128
TILE_CO = 1536     # Cout tile per grid step (3072 / 1536 = 2 steps)
N_TILES = C_OUT_PAD // TILE_CO


def relu_conv1x1_kernel(x_ref, w_ref, b_ref, o_ref):
    # x_ref: (N, C_IN_PAD) f32          -- resident (same block every step)
    # w_ref: (1, C_IN_PAD, TILE_CO) bf16 -- one tile-contiguous weight slab
    # b_ref: (1, TILE_CO) f32           -- bias tile for this output block
    # o_ref: (N, TILE_CO) f32
    x = jnp.maximum(x_ref[...], 0.0)                  # ReLU in f32 (VPU)
    x_bf = x.astype(jnp.bfloat16)                     # tiny cast, feeds MXU
    acc = jnp.dot(x_bf, w_ref[0], preferred_element_type=jnp.float32)
    o_ref[...] = (acc + b_ref[...]).astype(o_ref.dtype)


def prepare_params(weight, bias):
    """One-time (offline) weight transpose, padding, bf16 cast, tile layout.

    weight: (C_OUT, C_IN, 1, 1) f32; bias: (C_OUT,) f32.
    Returns:
      w_t: (N_TILES, C_IN_PAD, TILE_CO) bf16, tile-contiguous.
      b_p: (1, C_OUT_PAD) f32.
    """
    w2d = weight.reshape(C_OUT, C_IN).T                                  # (Cin, Cout)
    w_p = jnp.pad(w2d, ((0, C_IN_PAD - C_IN), (0, C_OUT_PAD - C_OUT)))
    w_p = w_p.astype(jnp.bfloat16)
    # Column tiles made contiguous: w_t[j, ci, k] = w_p[ci, j*TILE_CO + k]
    w_t = w_p.reshape(C_IN_PAD, N_TILES, TILE_CO).transpose(1, 0, 2)
    b_p = jnp.pad(bias, (0, C_OUT_PAD - C_OUT)).reshape(1, C_OUT_PAD)
    return jax.device_put(w_t), jax.device_put(b_p)


@jax.jit
def relu_conv2d(x_nchw, w_t, b_p):
    """x_nchw: (N, 726, 1, 1) f32; w_t: (N_TILES, C_IN_PAD, TILE_CO) bf16;
    b_p: (1, C_OUT_PAD) f32."""
    n = x_nchw.shape[0]

    # Flatten NCHW (H=W=1) -> (N, Cin) and pad Cin (only ~8 bytes/row of pad).
    # TODO(synk): could fold this tiny pad into the kernel via a zeroed VMEM
    # scratch if the extra XLA op ever shows up next to a hidden weight DMA.
    x2d = x_nchw.reshape(n, C_IN)
    x_p = jnp.pad(x2d, ((0, 0), (0, C_IN_PAD - C_IN)))

    grid = (N_TILES,)   # = 2 (even -> both v7x TensorCores pull weight DMA)

    w_bytes = N_TILES * C_IN_PAD * TILE_CO * 2          # bf16 weight
    io_bytes = n * C_IN_PAD * 4 + n * C_OUT_PAD * 4 + C_OUT_PAD * 4

    out_p = pl.pallas_call(
        relu_conv1x1_kernel,
        out_shape=jax.ShapeDtypeStruct((n, C_OUT_PAD), jnp.float32),
        grid_spec=pltpu.PrefetchScalarGridSpec(
            num_scalar_prefetch=0,
            grid=grid,
            in_specs=[
                pl.BlockSpec((n, C_IN_PAD), lambda j: (0, 0)),           # resident x
                pl.BlockSpec((1, C_IN_PAD, TILE_CO), lambda j: (j, 0, 0)),  # weight tile
                pl.BlockSpec((1, TILE_CO), lambda j: (0, j)),            # bias tile
            ],
            out_specs=pl.BlockSpec((n, TILE_CO), lambda j: (0, j)),
        ),
        compiler_params=pltpu.CompilerParams(
            dimension_semantics=("parallel",),
        ),
        cost_estimate=pl.CostEstimate(
            flops=2 * n * C_IN_PAD * C_OUT_PAD,
            transcendentals=0,
            bytes_accessed=w_bytes + io_bytes,
        ),
    )(x_p, w_t, b_p)

    # Drop Cout padding and reshape back to NCHW.
    out = out_p[:, :C_OUT]
    return out.reshape(n, C_OUT, 1, 1)


def reference(x_nchw, weight, bias):
    x = jnp.maximum(x_nchw.reshape(x_nchw.shape[0], C_IN), 0.0)
    w = weight.reshape(C_OUT, C_IN)
    y = x @ w.T + bias[None, :]
    return y.reshape(x_nchw.shape[0], C_OUT, 1, 1)


if __name__ == "__main__":
    key = jax.random.PRNGKey(0)
    k_x, k_w, k_b = jax.random.split(key, 3)

    # Input matches the PyTorch module: torch.Size([1, 726, 1, 1])
    x = jax.random.normal(k_x, (1, C_IN, 1, 1), dtype=jnp.float32)

    # Deterministic parameter init (shapes from Conv2d(726, 2904, 1x1)).
    fan_in = C_IN  # kernel is 1x1
    bound = 1.0 / (fan_in ** 0.5)
    weight = jax.random.uniform(
        k_w, (C_OUT, C_IN, 1, 1), minval=-bound, maxval=bound, dtype=jnp.float32
    )
    bias = jax.random.uniform(
        k_b, (C_OUT,), minval=-bound, maxval=bound, dtype=jnp.float32
    )

    # One-time weight/bias preprocessing (kept out of the jitted hot path).
    w_t, b_p = prepare_params(weight, bias)

    y = relu_conv2d(x, w_t, b_p)
    y = jax.block_until_ready(y)

    y_ref = reference(x, weight, bias)
    assert y.shape == (1, C_OUT, 1, 1), y.shape
    # bf16 weight path: relax tolerance vs. the f32 reference.
    max_err = float(jnp.max(jnp.abs(y - y_ref)))
    assert max_err < 2e-2, max_err
    print("KERNEL_OK")
</pallas_src>

<mosaic_0001>
module attributes {stable_mosaic.version = 11 : i64} {
  func.func @relu_conv1x1_kernel(%arg0: i32, %arg1: memref<1x728xf32, #tpu.memory_space<vmem>>, %arg2: memref<1x728x1536xbf16, #tpu.memory_space<vmem>>, %arg3: memref<1x1536xf32, #tpu.memory_space<vmem>>, %arg4: memref<1x1536xf32, #tpu.memory_space<vmem>>) attributes {dimension_semantics = [#tpu.dimension_semantics<parallel>], iteration_bounds = array<i64: 2>, scalar_prefetch = 0 : i64, scratch_operands = 0 : i64, tpu.core_type = #tpu.core_type<tc>, window_params = [{pipeline_mode = #tpu.pipeline_mode<synchronous>, transform_indices = @transform_0, window_bounds = array<i64: 1, 728>}, {transform_indices = @transform_1, window_bounds = array<i64: 1, 728, 1536>}, {transform_indices = @transform_2, window_bounds = array<i64: 1, 1536>}, {transform_indices = @transform_3, window_bounds = array<i64: 1, 1536>}]} {
    %c0 = arith.constant 0 : index
    %c0_0 = arith.constant 0 : index
    %0 = vector.load %arg1[%c0, %c0_0] : memref<1x728xf32, #tpu.memory_space<vmem>>, vector<1x728xf32>
    %cst = arith.constant 0.000000e+00 : f32
    %1 = vector.broadcast %cst : f32 to vector<1x728xf32>
    %2 = arith.maximumf %0, %1 : vector<1x728xf32>
    %3 = arith.truncf %2 : vector<1x728xf32> to vector<1x728xbf16>
    %c0_1 = arith.constant 0 : index
    %c0_2 = arith.constant 0 : index
    %c0_3 = arith.constant 0 : index
    %4 = vector.load %arg2[%c0_1, %c0_2, %c0_3] : memref<1x728x1536xbf16, #tpu.memory_space<vmem>>, vector<1x728x1536xbf16>
    %5 = vector.shape_cast %4 : vector<1x728x1536xbf16> to vector<728x1536xbf16>
    %cst_4 = arith.constant dense<0.000000e+00> : vector<1x1536xf32>
    %6 = tpu.matmul %3, %5, %cst_4 {dimension_numbers = #tpu.dot_dimension_numbers<[1], [0], [0], [1], [0, 0, 1, 1], [], []>} : vector<1x728xbf16>, vector<728x1536xbf16>, vector<1x1536xf32> -> vector<1x1536xf32>
    %c0_5 = arith.constant 0 : index
    %c0_6 = arith.constant 0 : index
    %7 = vector.load %arg3[%c0_5, %c0_6] : memref<1x1536xf32, #tpu.memory_space<vmem>>, vector<1x1536xf32>
    %8 = arith.addf %6, %7 : vector<1x1536xf32>
    %c0_7 = arith.constant 0 : index
    %c0_8 = arith.constant 0 : index
    %9 = vector.load %arg4[%c0_7, %c0_8] : memref<1x1536xf32, #tpu.memory_space<vmem>>, vector<1x1536xf32>
    tpu.vector_store %arg4[%c0_7, %c0_8], %8 {strides = array<i32>} : memref<1x1536xf32, #tpu.memory_space<vmem>>, vector<1x1536xf32>,
    return
  }
  func.func @transform_0(%arg0: i32) -> (i32, i32) {
    %c0_i32 = arith.constant 0 : i32
    %c0_i32_0 = arith.constant 0 : i32
    %c0_i32_1 = arith.constant 0 : i32
    return %c0_i32, %c0_i32_0 : i32, i32
  }
  func.func @transform_1(%arg0: i32) -> (i32, i32, i32) {
    %c0_i32 = arith.constant 0 : i32
    %c0_i32_0 = arith.constant 0 : i32
    %c0_i32_1 = arith.constant 0 : i32
    return %arg0, %c0_i32, %c0_i32_0 : i32, i32, i32
  }
  func.func @transform_2(%arg0: i32) -> (i32, i32) {
    %c0_i32 = arith.constant 0 : i32
    %c0_i32_0 = arith.constant 0 : i32
    return %c0_i32, %arg0 : i32, i32
  }
  func.func @transform_3(%arg0: i32) -> (i32, i32) {
    %c0_i32 = arith.constant 0 : i32
    %c0_i32_0 = arith.constant 0 : i32
    return %c0_i32, %arg0 : i32, i32
  }
}

</mosaic_0001>

<bundles_post_ra>
// kernel: relu_conv2d.1
= control target key start
LH: loop header
LB: loop body
LE: loop exit
PB: predicated region body
PF: predicated region fallthrough
CT: control target
= control target key end

     0   :  { %8 = vsyncpa [#allocation3], 0  ;;  %s7045_s0 = inlined_call_operand.vmem [shape: f32[1,728], index: 0, kind: input, shape index: {}]   ;;  %s7046_s1 = inlined_call_operand.hbm [shape: bf16[2,728,1536], index: 1, kind: input, shape index: {}]   ;;  %s7047_s2 = inlined_call_operand.hbm [shape: f32[1,3072], index: 2, kind: input, shape index: {}]   ;;  %s7048_s3 = inlined_call_operand.vmem [shape: f32[1,3072], index: 3, kind: output, shape index: {}]  }
   0x1   :  { %10 = vsyncpa [#allocation3 + $0x1], 0 }
   0x2   :  { %11 = vsyncpa [#allocation5], 0 }
   0x3   :  { %13 = vsyncpa [#allocation5 + $0x1], 0  ;;  %s6198_s12 = smov 0   ;;  %s6200_s13 = smov 0  }
   0x4   :  { %s6202_s14 = smov 0   ;;  %s6204_s15 = smov 0  }
   0x5 LB: > { %s4565_s16 = sadd.s32 4294967295, %s6171_s15   ;;  %s6218_s17 = sadd.s32 1, %s6171_s15   ;;  %s6171_s15 = sphi %s6204_s15, %s7059_s15   ;;  %s6167_s14 = sphi %s6202_s14, %s7058_s14   ;;  %s6163_s13 = sphi %s6200_s13, %s7057_s13   ;;  %s6159_s12 = sphi %s6198_s12, %s7056_s12  }
   0x6   : > { %s44_s18 = ssub.s32 %s6171_s15, %s6218_s17  ;;  %s47_s19 = sadd.s32 1, %s6167_s14 }
   0x7   : > { %p45_p0 = scmp.eq.s32.totalorder %s44_s18, 0  ;;  %p54_p1 = scmp.ne.s32.totalorder %s6167_s14, %s6163_s13 }
   0x8   : > { %p55_p2 = scmp.eq.s32.totalorder %s6171_s15, 0  ;;  %p60_p3 = scmp.ne.s32.totalorder %s6163_s13, %s6159_s12 }
   0x9   : > { %s6228_s20 = scalar_select %p45_p0, %s6167_s14, %s47_s19  }
   0xa   : > { %p56_p4 = por %p55_p2, %p54_p1  ;;  %p61_p5 = scmp.eq.s32.totalorder %s4565_s16, 0 }
   0xb   : > { %p5215_p6 = scmp.lt.s32.totalorder %s6171_s15, 2  ;;  %s6238_s22 = sand.u32 1, %s6167_s14  }
   0xc   : > { %p6233_p7 = por %p61_p5, %p60_p3  ;;  %s5199_s23 = smul.u32 4368, %s6238_s22 }
   0xd   : > { %s5200_s24 = smul.u32 69888, %s6171_s15  ;;  %p6242_p8 = pnand %p5215_p6, %p56_p4 }
   0xe   : > { %s7050_s21 = scalar_select %p6233_p7, 1, 0 }
   0xf   : > { %s6249_s28 = scalar_lea.hbm %s7046_s1, %s5200_s24  ;;  %s143_s29 = scalar_lea.vmem [#allocation2], %s5199_s23 }
  0x10   : > { %s150_s30 = sshll.u32 %s143_s29, 4  ;;  %s140_s4 = scalar_lea.sflag [#allocation3], %s6238_s22  ;;  %s6251_s30 = int_to_ptr.vmem [resolvable:$true] %s150_s30 }
  0x11   : > { %s6073_s5 = scalar_lea.hbm %s6249_s28, 69888  ;;  %p6075_p11 = pneg %p6242_p8 }
  0x12   : > { %p6074_p10 = scmp.ne.s32.totalorder %s6249_s28, %s6073_s5  ;;  %s6078_s8 = scalar_lea.hbm %s7046_s1, 139776 }
  0x13   : > { %p6079_p0 = scmp.lt.u32.totalorder %s6249_s28, %s7046_s1  ;;  %p6080_p1 = scmp.lt.u32.totalorder %s6078_s8, %s6073_s5 }
  0x14   : > { %p6076_p12 = pnand %p6075_p11, %p6074_p10  ;;  %p6082_p3 = scmp.lt.u32.totalorder %s6073_s5, %s6249_s28 }
  0x15   : > { %p6081_p2 = por %p6080_p1, %p6079_p0 }
  0x16   : > { %p6077_p13 = pneg %p6076_p12 }
  0x17   : > { %p6083_p4 = por %p6082_p3, %p6081_p2 }
  0x19   : > { %p6084_p5 = pnand %p6083_p4, %p6077_p13 }
  0x1b   : > { %6087 = shalt.err (!%p6084_p5)
}
  0x1c   : > { %s6088_s11 = scalar_lea.vmem %s6251_s30, 69888  ;;  %s6173_s12 = smov [#allocation2]  }
  0x1d   : > { %p6089_p6 = scmp.ne.s32.totalorder %s6251_s30, %s6088_s11  ;;  %s6093_s18 = sshll.u32 %s6173_s12, 4  ;;  %s6094_s18 = int_to_ptr.vmem [resolvable:$false] %s6093_s18 }
  0x1e   : > { %s6095_s19 = scalar_lea.vmem %s6094_s18, 139776  ;;  %p6096_p9 = scmp.lt.s32.totalorder %s6251_s30, %s6094_s18 }
  0x1f   : > { %p6091_p10 = pnand %p6089_p6, %p6075_p11  ;;  %p6097_p0 = scmp.lt.s32.totalorder %s6095_s19, %s6088_s11 }
  0x21   : > { %p6092_p12 = pneg %p6091_p10  ;;  %p6098_p1 = por %p6097_p0, %p6096_p9 }
  0x23   : > { %p6099_p2 = pnand %p6098_p1, %p6092_p12 }
  0x25   : > { %6102 = shalt.err (!%p6099_p2)
}
  0x26   : > { %s6174_s23 = smov 768   ;;  %s6175_s24 = smov 48  }
  0x27   : > { %5211 = dma.hbm_to_vmem [thread:$0]  (!%p6242_p8), %s6249_s28, 69888, %s6251_s30, %s140_s4, %s6174_s23, %s6174_s23, %s6175_s24  }
  0x28   : > { %p177_p13 = scmp.lt.s32.totalorder %s6171_s15, 3  ;;  %s5201_s26 = smul.u32 12, %s6238_s22 }
  0x29   : > { %p7052_p9 = scmp.ge.s32.totalorder %s6171_s15, 1  ;;  %s5138_s29 = smul.u32 192, %s6171_s15 }
  0x2a   : > { %s164_s8 = scalar_lea.vmem [#allocation4], %s5201_s26  ;;  %s161_s28 = scalar_lea.sflag [#allocation5], %s6238_s22 }
  0x2b   : > { %p6286_p3 = pnand %p7052_p9, %p177_p13  ;;  %s6294_s7 = scalar_lea.hbm %s7047_s2, %s5138_s29 }
  0x2c   : > { %s172_s9 = sshll.u32 %s164_s8, 4  ;;  %s6103_s30 = scalar_lea.hbm %s6294_s7, 192  ;;  %s173_s9 = int_to_ptr.vmem [resolvable:$true] %s172_s9 }
  0x2d   : > { %s7053_s27 = scalar_select %p6286_p3, 1, 0 }
  0x2e   : > { %p6104_p4 = scmp.ne.s32.totalorder %s6294_s7, %s6103_s30  ;;  %s6108_s11 = scalar_lea.hbm %s7047_s2, 384 }
  0x2f   : > { %p6109_p10 = scmp.lt.u32.totalorder %s6294_s7, %s7047_s2  ;;  %p6110_p12 = scmp.lt.u32.totalorder %s6108_s11, %s6103_s30 }
  0x30   : > { %p6106_p5 = pnand %p6104_p4, %p6075_p11  ;;  %p6112_p1 = scmp.lt.u32.totalorder %s6103_s30, %s6294_s7 }
  0x31   : > { %p6111_p0 = por %p6110_p12, %p6109_p10 }
  0x32   : > { %p6107_p6 = pneg %p6106_p5 }
  0x33   : > { %p6113_p2 = por %p6112_p1, %p6111_p0 }
  0x35   : > { %p6114_p13 = pnand %p6113_p2, %p6107_p6 }
  0x37   : > { %6117 = shalt.err (!%p6114_p13)
}
  0x38   : > { %s6118_s22 = scalar_lea.vmem %s173_s9, 192  ;;  %s6176_s19 = smov [#allocation4]  }
  0x39   : > { %p6119_p9 = scmp.ne.s32.totalorder %s173_s9, %s6118_s22  ;;  %s6123_s23 = sshll.u32 %s6176_s19, 4  ;;  %s6124_s23 = int_to_ptr.vmem [resolvable:$false] %s6123_s23 }
  0x3a   : > { %s6125_s24 = scalar_lea.vmem %s6124_s23, 384  ;;  %p6126_p7 = scmp.lt.s32.totalorder %s173_s9, %s6124_s23 }
  0x3b   : > { %p6121_p4 = pnand %p6119_p9, %p6075_p11  ;;  %p6127_p3 = scmp.lt.s32.totalorder %s6125_s24, %s6118_s22 }
  0x3d   : > { %p6122_p5 = pneg %p6121_p4  ;;  %p6128_p10 = por %p6127_p3, %p6126_p7 }
  0x3f   : > { %p6129_p12 = pnand %p6128_p10, %p6122_p5 }
  0x41   : > { %6132 = shalt.err (!%p6129_p12)
}
  0x42   : > { %5214 = dma.hbm_to_vmem [thread:$0]  (!%p6242_p8), %s6294_s7, 192, %s173_s9, %s161_s28  }
  0x43   : > { %p7054_p6 = scmp.ne.s32.totalorder %s7053_s27, 0 }
  0x44   : > { %s183_s26 = sand.u32 (!%p7054_p6), 1, %s6163_s13   ;;  %p7055_p11 = scmp.ne.s32.totalorder (!%p7054_p6), %s7050_s21, 0 }
  0x45   : > { %181 = sbr.rel (%p7054_p6) target bundleno = 858 (0x35a), region = 32  ;;  %s184_s5 = scalar_lea.sflag (!%p7054_p6), [#allocation3], %s183_s26 }
  0x46   : > { %s5202_s29 = smul.u32 (!%p7054_p6), 4368, %s183_s26 }
  0x48   : > { %s6319_s6 = scalar_lea.vmem (!%p7054_p6), [#allocation2], %s5202_s29 }
  0x4c   : > { %6150 = dma.done.wait (%p7055_p11), %s184_s5, 69888  }
  0x4d   : > { %6152 = vsyncadd (%p7055_p11), %s184_s5, 4294897408  ;;  %s5203_s8 = smul.u32 12, %s183_s26  ;;  %s193_s25 = scalar_lea.sflag [#allocation5], %s183_s26 }
  0x4f   : > { %s6325_s30 = scalar_lea.vmem [#allocation4], %s5203_s8 }
  0x50   : > { %6154 = dma.done.wait (%p7055_p11), %s193_s25, 192  }
  0x51   : > { %6156 = vsyncadd (%p7055_p11), %s193_s25, 4294967104  ;;  %v5251_v0 = vld [vmem:[%s6319_s6 + $0x4] ss:$48 sps:$4 sm:$0xff]   ;;  %v5253_v1 = vld [vmem:[%s6319_s6 + $0xc] ss:$48 sps:$4 sm:$0xff]   ;;  %v233_v38 = vlaneseq  ;;  %vm3609_vm0 = vcmask 719872  }
  0x52   : > { %3650 = vmatprep.subr.bf16.mxu0 %v5251_v0  ;;  %v5255_v2 = vld [vmem:[%s6319_s6] ss:$48 sps:$4 sm:$0xff]   ;;  %v5256_v3 = vld [vmem:[%s6319_s6 + $0x8] ss:$48 sps:$4 sm:$0xff]   ;;  %3773 = vmatprep.subr.bf16.mxu1 %v5253_v1  ;;  %v5257_v4 = vld [vmem:[%s6319_s6 + $0x64] ss:$48 sps:$4 sm:$0xff]  }
  0x53   : > { %3651 = vmatpush1.bf16.msra.mxu0 %v5255_v2  ;;  %3774 = vmatpush1.bf16.msra.mxu1 %v5256_v3  ;;  %v5259_v5 = vld [vmem:[%s6319_s6 + $0x6c] ss:$48 sps:$4 sm:$0xff]   ;;  %v5261_v6 = vld [vmem:[%s6319_s6 + $0x60] ss:$48 sps:$4 sm:$0xff]   ;;  %v5262_v7 = vld [vmem:[%s6319_s6 + $0x68] ss:$48 sps:$4 sm:$0xff]  }
  0x54   : > { %3652 = vmatprep.subr.bf16.mxu0 %v5257_v4  ;;  %3775 = vmatprep.subr.bf16.mxu1 %v5259_v5  ;;  %v5263_v8 = vld [vmem:[%s6319_s6 + $0xc4] ss:$48 sps:$4 sm:$0xff]   ;;  %v5265_v9 = vld [vmem:[%s6319_s6 + $0xcc] ss:$48 sps:$4 sm:$0xff]   ;;  %v5267_v10 = vld [vmem:[%s6319_s6 + $0xc0] ss:$48 sps:$4 sm:$0xff]  }
  0x55   : > { %v5268_v11 = vld [vmem:[%s6319_s6 + $0xc8] ss:$48 sps:$4 sm:$0xff]   ;;  %v5269_v12 = vld [vmem:[%s6319_s6 + $0x124] ss:$48 sps:$4 sm:$0xff]   ;;  %v5271_v13 = vld [vmem:[%s6319_s6 + $0x12c] ss:$48 sps:$4 sm:$0xff]  }
  0x56   : > { %v5273_v14 = vld [vmem:[%s6319_s6 + $0x120] ss:$48 sps:$4 sm:$0xff]   ;;  %v5274_v15 = vld [vmem:[%s6319_s6 + $0x128] ss:$48 sps:$4 sm:$0xff]   ;;  %v5275_v16 = vld [vmem:[%s6319_s6 + $0x184] ss:$48 sps:$4 sm:$0xff]  }
  0x57   : > { %3653 = vmatpush1.bf16.msra.mxu0 %v5261_v6  ;;  %3776 = vmatpush1.bf16.msra.mxu1 %v5262_v7  ;;  %v5277_v17 = vld [vmem:[%s6319_s6 + $0x18c] ss:$48 sps:$4 sm:$0xff]   ;;  %v5279_v18 = vld [vmem:[%s6319_s6 + $0x180] ss:$48 sps:$4 sm:$0xff]   ;;  %v5280_v19 = vld [vmem:[%s6319_s6 + $0x188] ss:$48 sps:$4 sm:$0xff]  }
  0x58   : > { %3654 = vmatprep.subr.bf16.mxu0 %v5263_v8  ;;  %3777 = vmatprep.subr.bf16.mxu1 %v5265_v9  ;;  %v5281_v20 = vld [vmem:[%s6319_s6 + $0x1e4] ss:$48 sps:$4 sm:$0xff]   ;;  %v5283_v21 = vld [vmem:[%s6319_s6 + $0x1ec] ss:$48 sps:$4 sm:$0xff]   ;;  %v5285_v22 = vld [vmem:[%s6319_s6 + $0x1e0] ss:$48 sps:$4 sm:$0xff]  }
  0x59   : > { %v5286_v23 = vld [vmem:[%s6319_s6 + $0x1e8] ss:$48 sps:$4 sm:$0xff]   ;;  %v5287_v24 = vld [vmem:[%s6319_s6 + $0x244] ss:$48 sps:$4 sm:$0xff]   ;;  %v5289_v25 = vld [vmem:[%s6319_s6 + $0x24c] ss:$48 sps:$4 sm:$0xff]  }
  0x5a   : > { %v5291_v26 = vld [vmem:[%s6319_s6 + $0x240] ss:$48 sps:$4 sm:$0xff]   ;;  %v5292_v27 = vld [vmem:[%s6319_s6 + $0x248] ss:$48 sps:$4 sm:$0xff]   ;;  %v5293_v28 = vld [vmem:[%s6319_s6 + $0x2a4] ss:$48 sps:$4 sm:$0xff]  }
  0x5b   : > { %3655 = vmatpush1.bf16.msra.mxu0 %v5267_v10  ;;  %3778 = vmatpush1.bf16.msra.mxu1 %v5268_v11  ;;  %v5295_v29 = vld [vmem:[%s6319_s6 + $0x2ac] ss:$48 sps:$4 sm:$0xff]   ;;  %v5297_v30 = vld [vmem:[%s6319_s6 + $0x2a0] ss:$48 sps:$4 sm:$0xff]   ;;  %v5298_v31 = vld [vmem:[%s6319_s6 + $0x2a8] ss:$48 sps:$4 sm:$0xff]  }
  0x5c   : > { %3656 = vmatprep.subr.bf16.mxu0 %v5269_v12  ;;  %3779 = vmatprep.subr.bf16.mxu1 %v5271_v13  ;;  %v5299_v32 = vld [vmem:[%s6319_s6 + $0x304] ss:$48 sps:$4 sm:$0xff]   ;;  %v5301_v33 = vld [vmem:[%s6319_s6 + $0x30c] ss:$48 sps:$4 sm:$0xff]   ;;  %v5303_v34 = vld [vmem:[%s6319_s6 + $0x300] ss:$48 sps:$4 sm:$0xff]  }
  0x5d   : > { %v5304_v35 = vld [vmem:[%s6319_s6 + $0x308] ss:$48 sps:$4 sm:$0xff]   ;;  %v5305_v36 = vld [vmem:[%s6319_s6 + $0x364] ss:$48 sps:$4 sm:$0xff]   ;;  %v5307_v37 = vld [vmem:[%s6319_s6 + $0x36c] ss:$48 sps:$4 sm:$0xff]  }
  0x5e   : > { %v5309_v39 = vld [vmem:[%s6319_s6 + $0x360] ss:$48 sps:$4 sm:$0xff]   ;;  %v5310_v40 = vld [vmem:[%s6319_s6 + $0x368] ss:$48 sps:$4 sm:$0xff]   ;;  %v5311_v41 = vld [vmem:[%s6319_s6 + $0x3c4] ss:$48 sps:$4 sm:$0xff]  }
  0x5f   : > { %3657 = vmatpush1.bf16.msra.mxu0 %v5273_v14  ;;  %3780 = vmatpush1.bf16.msra.mxu1 %v5274_v15  ;;  %v5313_v42 = vld [vmem:[%s6319_s6 + $0x3cc] ss:$48 sps:$4 sm:$0xff]   ;;  %v6374_v43 = vshrl.u32 %v233_v38, 7  ;;  %v5315_v44 = vld [vmem:[%s6319_s6 + $0x3c0] ss:$48 sps:$4 sm:$0xff]   ;;  %vm3613_vm1 = vcmask 1043456  }
  0x60   : > { %3658 = vmatprep.subr.bf16.mxu0 %v5275_v16  ;;  %3781 = vmatprep.subr.bf16.mxu1 %v5277_v17  ;;  %v5316_v45 = vld [vmem:[%s6319_s6 + $0x3c8] ss:$48 sps:$4 sm:$0xff]   ;;  %v5317_v46 = vld [vmem:[%s6319_s6 + $0x424] ss:$48 sps:$4 sm:$0xff]   ;;  %v5319_v47 = vld [vmem:[%s6319_s6 + $0x42c] ss:$48 sps:$4 sm:$0xff]  }
  0x61   : > { %v6381_v48 = vsub.s32 1, %v6374_v43  ;;  %v230_v49 = vld [vmem:[%s7045_s0] sm:$0x3f]  ;;  %v5322_v52 = vld [vmem:[%s6319_s6 + $0x428] ss:$48 sps:$4 sm:$0xff]   ;;  %v6408_v2 = vsub.s32 0, %v6374_v43 }
  0x62   : > { %v5321_v50 = vld [vmem:[%s6319_s6 + $0x420] ss:$48 sps:$4 sm:$0xff]   ;;  %v6387_v51 = vmax.f32 %v230_v49, 0.0  ;;  %v5323_v53 = vld [vmem:[%s6319_s6 + $0x484] ss:$48 sps:$4 sm:$0xff]   ;;  %v6414_v6 = vsub.s32 3, %v6374_v43 }
  0x63   : > { %3659 = vmatpush1.bf16.msra.mxu0 %v5279_v18  ;;  %3782 = vmatpush1.bf16.msra.mxu1 %v5280_v19  ;;  %v5325_v54 = vld [vmem:[%s6319_s6 + $0x48c] ss:$48 sps:$4 sm:$0xff]   ;;  %v5327_v56 = vld [vmem:[%s6319_s6 + $0x480] ss:$48 sps:$4 sm:$0xff]   ;;  %v5328_v58 = vld [vmem:[%s6319_s6 + $0x488] ss:$48 sps:$4 sm:$0xff]  }
  0x64   : > { %3660 = vmatprep.subr.bf16.mxu0 %v5281_v20  ;;  %3783 = vmatprep.subr.bf16.mxu1 %v5283_v21  ;;  %v240_v55 = vrot.slane %v6387_v51, %v6381_v48  ;;  %v5329_v59 = vld [vmem:[%s6319_s6 + $0x4e4] ss:$48 sps:$4 sm:$0xff]   ;;  %v5331_v60 = vld [vmem:[%s6319_s6 + $0x4ec] ss:$48 sps:$4 sm:$0xff]   ;;  %v5333_v61 = vld [vmem:[%s6319_s6 + $0x4e0] ss:$48 sps:$4 sm:$0xff]   ;;  %v236_v8 = vrot.slane %v6387_v51, %v6408_v2  ;;  %v248_v12 = vrot.slane %v6387_v51, %v6414_v6 }
  0x65   : > { %v5334_v62 = vld [vmem:[%s6319_s6 + $0x4e8] ss:$48 sps:$4 sm:$0xff]   ;;  %v5335_v63 = vld [vmem:[%s6319_s6 + $0x544] ss:$48 sps:$4 sm:$0xff]   ;;  %v5337_v0 = vld [vmem:[%s6319_s6 + $0x54c] ss:$48 sps:$4 sm:$0xff]  }
  0x66   : > { %v6395_v57 = vpack.c.bf16 %v240_v55, %v240_v55  ;;  %v5339_v1 = vld [vmem:[%s6319_s6 + $0x540] ss:$48 sps:$4 sm:$0xff]   ;;  %v5340_v3 = vld [vmem:[%s6319_s6 + $0x548] ss:$48 sps:$4 sm:$0xff]   ;;  %v5341_v4 = vld [vmem:[%s6319_s6 + $0x5a4] ss:$48 sps:$4 sm:$0xff]   ;;  %v6425_v14 = vpack.c.bf16 %v236_v8, %v236_v8  ;;  %v6430_v18 = vpack.c.bf16 %v248_v12, %v248_v12 }
  0x67   : > { %3661 = vmatpush1.bf16.msra.mxu0 %v5285_v22  ;;  %3784 = vmatpush1.bf16.msra.mxu1 %v5286_v23  ;;  %v5343_v5 = vld [vmem:[%s6319_s6 + $0x5ac] ss:$48 sps:$4 sm:$0xff]   ;;  %v5345_v7 = vld [vmem:[%s6319_s6 + $0x5a0] ss:$48 sps:$4 sm:$0xff]   ;;  %v5346_v9 = vld [vmem:[%s6319_s6 + $0x5a8] ss:$48 sps:$4 sm:$0xff]  }
  0x68   : > { %3662 = vmatprep.subr.bf16.mxu0 %v5287_v24  ;;  %3785 = vmatprep.subr.bf16.mxu1 %v5289_v25  ;;  %v5349_v10 = vld [vmem:[%s6319_s6 + $0x604] ss:$48 sps:$4 sm:$0xff]   ;;  %v5352_v11 = vld [vmem:[%s6319_s6 + $0x60c] ss:$48 sps:$4 sm:$0xff]   ;;  %v5347_v13 = vld [vmem:[%s6319_s6 + $0x600] ss:$48 sps:$4 sm:$0xff]  }
  0x69   : > { %3682 = vmatprep.mubr.bf16.mxu0 %v6395_v57  ;;  %3805 = vmatprep.mubr.bf16.mxu1 %v6395_v57  ;;  %v5350_v15 = vld [vmem:[%s6319_s6 + $0x608] ss:$48 sps:$4 sm:$0xff]   ;;  %v5355_v16 = vld [vmem:[%s6319_s6 + $0x664] ss:$48 sps:$4 sm:$0xff]   ;;  %v5358_v17 = vld [vmem:[%s6319_s6 + $0x66c] ss:$48 sps:$4 sm:$0xff]  }
  0x6a   : > { %v5353_v19 = vld [vmem:[%s6319_s6 + $0x660] ss:$48 sps:$4 sm:$0xff]   ;;  %v5356_v20 = vld [vmem:[%s6319_s6 + $0x668] ss:$48 sps:$4 sm:$0xff]   ;;  %v5361_v21 = vld [vmem:[%s6319_s6 + $0x6c4] ss:$48 sps:$4 sm:$0xff]  }
  0x6b   : > { %3663 = vmatpush1.bf16.msra.mxu0 %v5291_v26  ;;  %3786 = vmatpush1.bf16.msra.mxu1 %v5292_v27  ;;  %v5364_v22 = vld [vmem:[%s6319_s6 + $0x6cc] ss:$48 sps:$4 sm:$0xff]   ;;  %v5359_v23 = vld [vmem:[%s6319_s6 + $0x6c0] ss:$48 sps:$4 sm:$0xff]   ;;  %v5362_v24 = vld [vmem:[%s6319_s6 + $0x6c8] ss:$48 sps:$4 sm:$0xff]  }
  0x6c   : > { %3664 = vmatprep.subr.bf16.mxu0 %v5293_v28  ;;  %3787 = vmatprep.subr.bf16.mxu1 %v5295_v29  ;;  %v5367_v25 = vld [vmem:[%s6319_s6 + $0x724] ss:$48 sps:$4 sm:$0xff]   ;;  %v5370_v26 = vld [vmem:[%s6319_s6 + $0x72c] ss:$48 sps:$4 sm:$0xff]   ;;  %v5365_v27 = vld [vmem:[%s6319_s6 + $0x720] ss:$48 sps:$4 sm:$0xff]  }
  0x6d   : > { %v5368_v28 = vld [vmem:[%s6319_s6 + $0x728] ss:$48 sps:$4 sm:$0xff]   ;;  %v5373_v29 = vld [vmem:[%s6319_s6 + $0x784] ss:$48 sps:$4 sm:$0xff]   ;;  %v5400_v49 = vld [vmem:[%s6319_s6 + $0x90c] ss:$48 sps:$4 sm:$0xff]  }
  0x6e   : > { %v5401_v55 = vld [vmem:[%s6319_s6 + $0x960] ss:$48 sps:$4 sm:$0xff]   ;;  %v5427_v8 = vld [vmem:[%s6319_s6 + $0xae4] ss:$48 sps:$4 sm:$0xff]   ;;  %s224_s7 = smul.u32 12, %s4565_s16  ;;  %vm4478_vm2 = vcmp.lt.s32.totalorder %v233_v38, 512 }
  0x6f   : > { %3665 = vmatpush1.bf16.msra.mxu0 %v5297_v30  ;;  %3788 = vmatpush1.bf16.msra.mxu1 %v5298_v31  ;;  %v5376_v30 = vld [vmem:[%s6319_s6 + $0x78c] ss:$48 sps:$4 sm:$0xff]   ;;  %v5371_v31 = vld [vmem:[%s6319_s6 + $0x780] ss:$48 sps:$4 sm:$0xff]   ;;  %v5433_v12 = vld [vmem:[%s6319_s6 + $0xb44] ss:$48 sps:$4 sm:$0xff]  }
  0x70   : > { %3666 = vmatprep.subr.bf16.mxu0 %v5299_v32  ;;  %3789 = vmatprep.subr.bf16.mxu1 %v5301_v33  ;;  %v5374_v32 = vld [vmem:[%s6319_s6 + $0x788] ss:$48 sps:$4 sm:$0xff]   ;;  %v5379_v33 = vld [vmem:[%s6319_s6 + $0x7e4] ss:$48 sps:$4 sm:$0xff]   ;;  %p225_p7 = scmp.lt.s32.totalorder %s224_s7, 23 }
  0x72   : > { %s7061_s7 = smov (!%p225_p7, %s224_s7), 23 }
  0x73   : > { %3667 = vmatpush1.bf16.msra.mxu0 %v5303_v34  ;;  %3790 = vmatpush1.bf16.msra.mxu1 %v5304_v35  ;;  %v5382_v34 = vld [vmem:[%s6319_s6 + $0x7ec] ss:$48 sps:$4 sm:$0xff]   ;;  %v5377_v35 = vld [vmem:[%s6319_s6 + $0x7e0] ss:$48 sps:$4 sm:$0xff]   ;;  %s227_s9 = scalar_lea.vmem %s7048_s3, %s7061_s7 }
  0x74   : > { %3668 = vmatprep.subr.bf16.mxu0 %v5305_v36  ;;  %3791 = vmatprep.subr.bf16.mxu1 %v5307_v37  ;;  %v5380_v36 = vld [vmem:[%s6319_s6 + $0x7e8] ss:$48 sps:$4 sm:$0xff]   ;;  %v5385_v37 = vld [vmem:[%s6319_s6 + $0x844] ss:$48 sps:$4 sm:$0xff]  }
  0x77   : > { %3669 = vmatpush1.bf16.msra.mxu0 %v5309_v39  ;;  %3792 = vmatpush1.bf16.msra.mxu1 %v5310_v40  ;;  %v5388_v39 = vld [vmem:[%s6319_s6 + $0x84c] ss:$48 sps:$4 sm:$0xff]   ;;  %v5383_v40 = vld [vmem:[%s6319_s6 + $0x840] ss:$48 sps:$4 sm:$0xff]  }
  0x78   : > { %3670 = vmatprep.subr.bf16.mxu0 %v5311_v41  ;;  %3793 = vmatprep.subr.bf16.mxu1 %v5313_v42  ;;  %v5386_v41 = vld [vmem:[%s6319_s6 + $0x848] ss:$48 sps:$4 sm:$0xff]   ;;  %v5391_v42 = vld [vmem:[%s6319_s6 + $0x8a4] ss:$48 sps:$4 sm:$0xff]  }
  0x7b   : > { %3671 = vmatpush1.bf16.msra.mxu0 %v5315_v44  ;;  %3794 = vmatpush1.bf16.msra.mxu1 %v5316_v45  ;;  %v5394_v44 = vld [vmem:[%s6319_s6 + $0x8ac] ss:$48 sps:$4 sm:$0xff]   ;;  %v5389_v45 = vld [vmem:[%s6319_s6 + $0x8a0] ss:$48 sps:$4 sm:$0xff]  }
  0x7c   : > { %3672 = vmatprep.subr.bf16.mxu0 %v5317_v46  ;;  %3795 = vmatprep.subr.bf16.mxu1 %v5319_v47  ;;  %v5392_v46 = vld [vmem:[%s6319_s6 + $0x8a8] ss:$48 sps:$4 sm:$0xff]   ;;  %v5397_v47 = vld [vmem:[%s6319_s6 + $0x904] ss:$48 sps:$4 sm:$0xff]  }
  0x7f   : > { %3673 = vmatpush1.bf16.msra.mxu0 %v5321_v50  ;;  %3796 = vmatpush1.bf16.msra.mxu1 %v5322_v52  ;;  %v5395_v50 = vld [vmem:[%s6319_s6 + $0x900] ss:$48 sps:$4 sm:$0xff]   ;;  %v5398_v52 = vld [vmem:[%s6319_s6 + $0x908] ss:$48 sps:$4 sm:$0xff]  }
  0x80   : > { %3674 = vmatprep.subr.bf16.mxu0 %v5323_v53  ;;  %3797 = vmatprep.subr.bf16.mxu1 %v5325_v54  ;;  %v5403_v53 = vld [vmem:[%s6319_s6 + $0x964] ss:$48 sps:$4 sm:$0xff]   ;;  %v5406_v54 = vld [vmem:[%s6319_s6 + $0x96c] ss:$48 sps:$4 sm:$0xff]  }
  0x83   : > { %3675 = vmatpush1.bf16.msra.mxu0 %v5327_v56  ;;  %3798 = vmatpush1.bf16.msra.mxu1 %v5328_v58  ;;  %v5404_v56 = vld [vmem:[%s6319_s6 + $0x968] ss:$48 sps:$4 sm:$0xff]   ;;  %v5409_v58 = vld [vmem:[%s6319_s6 + $0x9c4] ss:$48 sps:$4 sm:$0xff]  }
  0x84   : > { %3676 = vmatprep.subr.bf16.mxu0 %v5329_v59  ;;  %3799 = vmatprep.subr.bf16.mxu1 %v5331_v60  ;;  %v5412_v59 = vld [vmem:[%s6319_s6 + $0x9cc] ss:$48 sps:$4 sm:$0xff]   ;;  %v5407_v60 = vld [vmem:[%s6319_s6 + $0x9c0] ss:$48 sps:$4 sm:$0xff]  }
  0x87   : > { %3677 = vmatpush1.bf16.msra.mxu0 %v5333_v61  ;;  %3800 = vmatpush1.bf16.msra.mxu1 %v5334_v62  ;;  %v5410_v61 = vld [vmem:[%s6319_s6 + $0x9c8] ss:$48 sps:$4 sm:$0xff]   ;;  %v5415_v62 = vld [vmem:[%s6319_s6 + $0xa24] ss:$48 sps:$4 sm:$0xff]  }
  0x88   : > { %3678 = vmatprep.subr.bf16.mxu0 %v5335_v63  ;;  %3801 = vmatprep.subr.bf16.mxu1 %v5337_v0  ;;  %v5418_v63 = vld [vmem:[%s6319_s6 + $0xa2c] ss:$48 sps:$4 sm:$0xff]   ;;  %v5413_v0 = vld [vmem:[%s6319_s6 + $0xa20] ss:$48 sps:$4 sm:$0xff]  }
  0x8b   : > { %3679 = vmatpush1.bf16.msra.mxu0 %v5339_v1  ;;  %3802 = vmatpush1.bf16.msra.mxu1 %v5340_v3  ;;  %v5416_v1 = vld [vmem:[%s6319_s6 + $0xa28] ss:$48 sps:$4 sm:$0xff]   ;;  %v5421_v3 = vld [vmem:[%s6319_s6 + $0xa84] ss:$48 sps:$4 sm:$0xff]  }
  0x8c   : > { %3680 = vmatprep.subr.bf16.mxu0 %v5341_v4  ;;  %3803 = vmatprep.subr.bf16.mxu1 %v5343_v5  ;;  %v5424_v4 = vld [vmem:[%s6319_s6 + $0xa8c] ss:$48 sps:$4 sm:$0xff]   ;;  %v5419_v5 = vld [vmem:[%s6319_s6 + $0xa80] ss:$48 sps:$4 sm:$0xff]  }
  0x8f   : > { %3681 = vmatpush1.bf16.msra.mxu0 %v5345_v7  ;;  %3804 = vmatpush1.bf16.msra.mxu1 %v5346_v9  ;;  %v5422_v7 = vld [vmem:[%s6319_s6 + $0xa88] ss:$48 sps:$4 sm:$0xff]   ;;  %v5430_v9 = vld [vmem:[%s6319_s6 + $0xaec] ss:$48 sps:$4 sm:$0xff]  }
  0x90   : > { %3691 = vmatprep.subr.bf16.mxu0 %v5349_v10  ;;  %3814 = vmatprep.subr.bf16.mxu1 %v5352_v11  ;;  %v5425_v10 = vld [vmem:[%s6319_s6 + $0xae0] ss:$48 sps:$4 sm:$0xff]   ;;  %v5428_v11 = vld [vmem:[%s6319_s6 + $0xae8] ss:$48 sps:$4 sm:$0xff]  }
  0x92   : > { %3683 = vmatmul.mubr.bf16.vlgmr.msra.gmra.mrb[0].mxu0 %v6425_v14  ;;  %3806 = vmatmul.mubr.bf16.vlgmr.msra.gmra.mrb[0].mxu1 %v6425_v14 }
  0x93   : > { %3692 = vmatpush1.bf16.msra.mxu0 %v5347_v13  ;;  %3815 = vmatpush1.bf16.msra.mxu1 %v5350_v15  ;;  %v5436_v13 = vld [vmem:[%s6319_s6 + $0xb4c] ss:$48 sps:$4 sm:$0xff]   ;;  %v6489_v15 = vsub.s32 2, %v6374_v43 }
  0x94   : > { %3693 = vmatprep.subr.bf16.mxu0 %v5355_v16  ;;  %3816 = vmatprep.subr.bf16.mxu1 %v5358_v17  ;;  %v5431_v16 = vld [vmem:[%s6319_s6 + $0xb40] ss:$48 sps:$4 sm:$0xff]   ;;  %v5434_v17 = vld [vmem:[%s6319_s6 + $0xb48] ss:$48 sps:$4 sm:$0xff]  }
  0x95   : > { %3723 = vmatprep.mubr.bf16.mxu0 %v6430_v18  ;;  %3846 = vmatprep.mubr.bf16.mxu1 %v6430_v18 }
  0x97   : > { %3694 = vmatpush1.bf16.msra.mxu0 %v5353_v19  ;;  %3817 = vmatpush1.bf16.msra.mxu1 %v5356_v20  ;;  %v5439_v19 = vld [vmem:[%s6319_s6 + $0xba4] ss:$48 sps:$4 sm:$0xff]   ;;  %v5442_v20 = vld [vmem:[%s6319_s6 + $0xbac] ss:$48 sps:$4 sm:$0xff]  }
  0x98   : > { %3695 = vmatprep.subr.bf16.mxu0 %v5361_v21  ;;  %3818 = vmatprep.subr.bf16.mxu1 %v5364_v22  ;;  %v255_v21 = vsub.s32 5, %v6374_v43  ;;  %v5437_v22 = vld [vmem:[%s6319_s6 + $0xba0] ss:$48 sps:$4 sm:$0xff]  }
  0x9b   : > { %3696 = vmatpush1.bf16.msra.mxu0 %v5359_v23  ;;  %3819 = vmatpush1.bf16.msra.mxu1 %v5362_v24  ;;  %v244_v23 = vrot.slane %v6387_v51, %v6489_v15  ;;  %v5440_v24 = vld [vmem:[%s6319_s6 + $0xba8] ss:$48 sps:$4 sm:$0xff]  }
  0x9c   : > { %3697 = vmatprep.subr.bf16.mxu0 %v5367_v25  ;;  %3820 = vmatprep.subr.bf16.mxu1 %v5370_v26  ;;  %v5445_v25 = vld [vmem:[%s6319_s6 + $0xc04] ss:$48 sps:$4 sm:$0xff]   ;;  %v5448_v26 = vld [vmem:[%s6319_s6 + $0xc0c] ss:$48 sps:$4 sm:$0xff]  }
  0x9f   : > { %3698 = vmatpush1.bf16.msra.mxu0 %v5365_v27  ;;  %3821 = vmatpush1.bf16.msra.mxu1 %v5368_v28  ;;  %v256_v27 = vrot.slane %v6387_v51, %v255_v21  ;;  %v5443_v28 = vld [vmem:[%s6319_s6 + $0xc00] ss:$48 sps:$4 sm:$0xff]  }
  0xa0   : > { %3699 = vmatprep.subr.bf16.mxu0 %v5373_v29  ;;  %3822 = vmatprep.subr.bf16.mxu1 %v5376_v30  ;;  %v6506_v29 = vpack.c.bf16 %v244_v23, %v244_v23  ;;  %v5446_v30 = vld [vmem:[%s6319_s6 + $0xc08] ss:$48 sps:$4 sm:$0xff]   ;;  %v5517_v23 = vld [vmem:[%s6319_s6 + $0x1084] ss:$48 sps:$4 sm:$0xff]  }
  0xa3   : > { %3700 = vmatpush1.bf16.msra.mxu0 %v5371_v31  ;;  %3823 = vmatpush1.bf16.msra.mxu1 %v5374_v32  ;;  %v5451_v31 = vld [vmem:[%s6319_s6 + $0xc64] ss:$48 sps:$4 sm:$0xff]   ;;  %v5454_v32 = vld [vmem:[%s6319_s6 + $0xc6c] ss:$48 sps:$4 sm:$0xff]  }
  0xa4   : > { %3701 = vmatprep.subr.bf16.mxu0 %v5379_v33  ;;  %3824 = vmatprep.subr.bf16.mxu1 %v5382_v34  ;;  %v6511_v33 = vpack.c.bf16 %v256_v27, %v256_v27  ;;  %v5449_v34 = vld [vmem:[%s6319_s6 + $0xc60] ss:$48 sps:$4 sm:$0xff]   ;;  %v251_v27 = vsub.s32 4, %v6374_v43 }
  0xa7   : > { %3702 = vmatpush1.bf16.msra.mxu0 %v5377_v35  ;;  %3825 = vmatpush1.bf16.msra.mxu1 %v5380_v36  ;;  %v5452_v35 = vld [vmem:[%s6319_s6 + $0xc68] ss:$48 sps:$4 sm:$0xff]   ;;  %v5457_v36 = vld [vmem:[%s6319_s6 + $0xcc4] ss:$48 sps:$4 sm:$0xff]  }
  0xa8   : > { %3703 = vmatprep.subr.bf16.mxu0 %v5385_v37  ;;  %3826 = vmatprep.subr.bf16.mxu1 %v5388_v39  ;;  %v5460_v37 = vld [vmem:[%s6319_s6 + $0xccc] ss:$48 sps:$4 sm:$0xff]   ;;  %v5455_v39 = vld [vmem:[%s6319_s6 + $0xcc0] ss:$48 sps:$4 sm:$0xff]  }
  0xab   : > { %3704 = vmatpush1.bf16.msra.mxu0 %v5383_v40  ;;  %3827 = vmatpush1.bf16.msra.mxu1 %v5386_v41  ;;  %v5458_v40 = vld [vmem:[%s6319_s6 + $0xcc8] ss:$48 sps:$4 sm:$0xff]   ;;  %v5463_v41 = vld [vmem:[%s6319_s6 + $0xd24] ss:$48 sps:$4 sm:$0xff]  }
  0xac   : > { %3705 = vmatprep.subr.bf16.mxu0 %v5391_v42  ;;  %3828 = vmatprep.subr.bf16.mxu1 %v5394_v44  ;;  %v5466_v42 = vld [vmem:[%s6319_s6 + $0xd2c] ss:$48 sps:$4 sm:$0xff]   ;;  %v5461_v44 = vld [vmem:[%s6319_s6 + $0xd20] ss:$48 sps:$4 sm:$0xff]  }
  0xaf   : > { %3706 = vmatpush1.bf16.msra.mxu0 %v5389_v45  ;;  %3829 = vmatpush1.bf16.msra.mxu1 %v5392_v46  ;;  %v5464_v45 = vld [vmem:[%s6319_s6 + $0xd28] ss:$48 sps:$4 sm:$0xff]   ;;  %v5469_v46 = vld [vmem:[%s6319_s6 + $0xd84] ss:$48 sps:$4 sm:$0xff]  }
  0xb0   : > { %3707 = vmatprep.subr.bf16.mxu0 %v5397_v47  ;;  %3830 = vmatprep.subr.bf16.mxu1 %v5400_v49  ;;  %v5472_v47 = vld [vmem:[%s6319_s6 + $0xd8c] ss:$48 sps:$4 sm:$0xff]   ;;  %v5467_v49 = vld [vmem:[%s6319_s6 + $0xd80] ss:$48 sps:$4 sm:$0xff]  }
  0xb3   : > { %3708 = vmatpush1.bf16.msra.mxu0 %v5395_v50  ;;  %3831 = vmatpush1.bf16.msra.mxu1 %v5398_v52  ;;  %v5470_v50 = vld [vmem:[%s6319_s6 + $0xd88] ss:$48 sps:$4 sm:$0xff]   ;;  %v5475_v52 = vld [vmem:[%s6319_s6 + $0xde4] ss:$48 sps:$4 sm:$0xff]  }
  0xb4   : > { %3709 = vmatprep.subr.bf16.mxu0 %v5403_v53  ;;  %3832 = vmatprep.subr.bf16.mxu1 %v5406_v54  ;;  %v5478_v53 = vld [vmem:[%s6319_s6 + $0xdec] ss:$48 sps:$4 sm:$0xff]   ;;  %v5473_v54 = vld [vmem:[%s6319_s6 + $0xde0] ss:$48 sps:$4 sm:$0xff]  }
  0xb7   : > { %3710 = vmatpush1.bf16.msra.mxu0 %v5401_v55  ;;  %3833 = vmatpush1.bf16.msra.mxu1 %v5404_v56  ;;  %v5476_v55 = vld [vmem:[%s6319_s6 + $0xde8] ss:$48 sps:$4 sm:$0xff]   ;;  %v5481_v56 = vld [vmem:[%s6319_s6 + $0xe44] ss:$48 sps:$4 sm:$0xff]  }
  0xb8   : > { %3711 = vmatprep.subr.bf16.mxu0 %v5409_v58  ;;  %3834 = vmatprep.subr.bf16.mxu1 %v5412_v59  ;;  %v5484_v58 = vld [vmem:[%s6319_s6 + $0xe4c] ss:$48 sps:$4 sm:$0xff]   ;;  %v5479_v59 = vld [vmem:[%s6319_s6 + $0xe40] ss:$48 sps:$4 sm:$0xff]  }
  0xbb   : > { %3712 = vmatpush1.bf16.msra.mxu0 %v5407_v60  ;;  %3835 = vmatpush1.bf16.msra.mxu1 %v5410_v61  ;;  %v5482_v60 = vld [vmem:[%s6319_s6 + $0xe48] ss:$48 sps:$4 sm:$0xff]   ;;  %v5487_v61 = vld [vmem:[%s6319_s6 + $0xea4] ss:$48 sps:$4 sm:$0xff]  }
  0xbc   : > { %3713 = vmatprep.subr.bf16.mxu0 %v5415_v62  ;;  %3836 = vmatprep.subr.bf16.mxu1 %v5418_v63  ;;  %v5490_v62 = vld [vmem:[%s6319_s6 + $0xeac] ss:$48 sps:$4 sm:$0xff]   ;;  %v5485_v63 = vld [vmem:[%s6319_s6 + $0xea0] ss:$48 sps:$4 sm:$0xff]  }
  0xbf   : > { %3714 = vmatpush1.bf16.msra.mxu0 %v5413_v0  ;;  %3837 = vmatpush1.bf16.msra.mxu1 %v5416_v1  ;;  %v5488_v0 = vld [vmem:[%s6319_s6 + $0xea8] ss:$48 sps:$4 sm:$0xff]   ;;  %v5493_v1 = vld [vmem:[%s6319_s6 + $0xf04] ss:$48 sps:$4 sm:$0xff]  }
  0xc0   : > { %3715 = vmatprep.subr.bf16.mxu0 %v5421_v3  ;;  %3838 = vmatprep.subr.bf16.mxu1 %v5424_v4  ;;  %v5496_v3 = vld [vmem:[%s6319_s6 + $0xf0c] ss:$48 sps:$4 sm:$0xff]   ;;  %v5491_v4 = vld [vmem:[%s6319_s6 + $0xf00] ss:$48 sps:$4 sm:$0xff]  }
  0xc3   : > { %3716 = vmatpush1.bf16.msra.mxu0 %v5419_v5  ;;  %3839 = vmatpush1.bf16.msra.mxu1 %v5422_v7  ;;  %v5494_v5 = vld [vmem:[%s6319_s6 + $0xf08] ss:$48 sps:$4 sm:$0xff]   ;;  %v5499_v7 = vld [vmem:[%s6319_s6 + $0xf64] ss:$48 sps:$4 sm:$0xff]  }
  0xc4   : > { %3717 = vmatprep.subr.bf16.mxu0 %v5427_v8  ;;  %3840 = vmatprep.subr.bf16.mxu1 %v5430_v9  ;;  %v5502_v8 = vld [vmem:[%s6319_s6 + $0xf6c] ss:$48 sps:$4 sm:$0xff]   ;;  %v5497_v9 = vld [vmem:[%s6319_s6 + $0xf60] ss:$48 sps:$4 sm:$0xff]  }
  0xc7   : > { %3718 = vmatpush1.bf16.msra.mxu0 %v5425_v10  ;;  %3841 = vmatpush1.bf16.msra.mxu1 %v5428_v11  ;;  %v5500_v10 = vld [vmem:[%s6319_s6 + $0xf68] ss:$48 sps:$4 sm:$0xff]   ;;  %v5505_v11 = vld [vmem:[%s6319_s6 + $0xfc4] ss:$48 sps:$4 sm:$0xff]  }
  0xc8   : > { %3719 = vmatprep.subr.bf16.mxu0 %v5433_v12  ;;  %3842 = vmatprep.subr.bf16.mxu1 %v5436_v13  ;;  %v5508_v12 = vld [vmem:[%s6319_s6 + $0xfcc] ss:$48 sps:$4 sm:$0xff]   ;;  %v5503_v13 = vld [vmem:[%s6319_s6 + $0xfc0] ss:$48 sps:$4 sm:$0xff]  }
  0xcb   : > { %3720 = vmatpush1.bf16.msra.mxu0 %v5431_v16  ;;  %3843 = vmatpush1.bf16.msra.mxu1 %v5434_v17  ;;  %v5506_v16 = vld [vmem:[%s6319_s6 + $0xfc8] ss:$48 sps:$4 sm:$0xff]   ;;  %v5511_v17 = vld [vmem:[%s6319_s6 + $0x1024] ss:$48 sps:$4 sm:$0xff]  }
  0xcc   : > { %3721 = vmatprep.subr.bf16.mxu0 %v5439_v19  ;;  %3844 = vmatprep.subr.bf16.mxu1 %v5442_v20  ;;  %v5514_v19 = vld [vmem:[%s6319_s6 + $0x102c] ss:$48 sps:$4 sm:$0xff]   ;;  %v5509_v20 = vld [vmem:[%s6319_s6 + $0x1020] ss:$48 sps:$4 sm:$0xff]  }
  0xcf   : > { %3722 = vmatpush1.bf16.msra.mxu0 %v5437_v22  ;;  %3845 = vmatpush1.bf16.msra.mxu1 %v5440_v24  ;;  %v5512_v22 = vld [vmem:[%s6319_s6 + $0x1028] ss:$48 sps:$4 sm:$0xff]   ;;  %v5520_v24 = vld [vmem:[%s6319_s6 + $0x108c] ss:$48 sps:$4 sm:$0xff]  }
  0xd0   : > { %3732 = vmatprep.subr.bf16.mxu0 %v5445_v25  ;;  %3855 = vmatprep.subr.bf16.mxu1 %v5448_v26  ;;  %v809_v25 = vld [vmem:[%s6319_s6 + $0x10e0] sm:$0xff]  ;;  %v810_v26 = vld [vmem:[%s6319_s6 + $0x10e8] sm:$0xff] }
  0xd2   : > { %3724 = vmatmul.mubr.bf16.vlgmr.msra.gmra.mrb[0].mxu0 %v6506_v29  ;;  %3847 = vmatmul.mubr.bf16.vlgmr.msra.gmra.mrb[0].mxu1 %v6506_v29 }
  0xd3   : > { %3733 = vmatpush1.bf16.msra.mxu0 %v5443_v28  ;;  %3856 = vmatpush1.bf16.msra.mxu1 %v5446_v30  ;;  %v5515_v28 = vld [vmem:[%s6319_s6 + $0x1080] ss:$48 sps:$4 sm:$0xff]   ;;  %v5518_v30 = vld [vmem:[%s6319_s6 + $0x1088] ss:$48 sps:$4 sm:$0xff]  }
  0xd4   : > { %3734 = vmatprep.subr.bf16.mxu0 %v5451_v31  ;;  %3857 = vmatprep.subr.bf16.mxu1 %v5454_v32  ;;  %v5113_v31 = vcombine.high %v809_v25, %v809_v25  ;;  %v5115_v32 = vcombine.high %v810_v26, %v810_v26 }
  0xd5   : > { %5125 = vmatprep.mubr.msk.bf16.mxu0 %vm3609_vm0, %v6511_v33  ;;  %5127 = vmatprep.mubr.msk.bf16.mxu1 %vm3609_vm0, %v6511_v33 }
  0xd7   : > { %3735 = vmatpush1.bf16.msra.mxu0 %v5449_v34  ;;  %3858 = vmatpush1.bf16.msra.mxu1 %v5452_v35  ;;  %v5112_v34 = vcombine.low %v809_v25, %v809_v25  ;;  %v5114_v35 = vcombine.low %v810_v26, %v810_v26  ;;  %v5582_v25 = vld [vmem:[%s6319_s6 + $0x378] ss:$48 sps:$4 sm:$0xff]   ;;  %v5587_v26 = vld [vmem:[%s6319_s6 + $0x3d4] ss:$48 sps:$4 sm:$0xff]  }
  0xd8   : > { %3736 = vmatprep.subr.bf16.mxu0 %v5457_v36  ;;  %3859 = vmatprep.subr.bf16.mxu1 %v5460_v37  ;;  %v252_v36 = vrot.slane %v6387_v51, %v251_v27  ;;  %v5527_v37 = vld [vmem:[%s6319_s6 + $0x14] ss:$48 sps:$4 sm:$0xff]   ;;  %v5528_v51 = vld [vmem:[%s6319_s6 + $0x18] ss:$48 sps:$4 sm:$0xff]  }
  0xdb   : > { %3737 = vmatpush1.bf16.msra.mxu0 %v5455_v39  ;;  %3860 = vmatpush1.bf16.msra.mxu1 %v5458_v40  ;;  %v3615_v39 = vsel %vm3613_vm1, %v5112_v34, 0  ;;  %v3621_v40 = vsel %vm3613_vm1, %v5114_v35, 0  ;;  %v5596_v34 = vld [vmem:[%s6319_s6 + $0x43c] ss:$48 sps:$4 sm:$0xff]   ;;  %v5591_v35 = vld [vmem:[%s6319_s6 + $0x430] ss:$48 sps:$4 sm:$0xff]  }
  0xdc   : > { %3738 = vmatprep.subr.bf16.mxu0 %v5463_v41  ;;  %3861 = vmatprep.subr.bf16.mxu1 %v5466_v42  ;;  %v5530_v41 = vld [vmem:[%s6319_s6 + $0x1c] ss:$48 sps:$4 sm:$0xff]   ;;  %v6577_v42 = vpack.c.bf16 %v252_v36, %v252_v36  ;;  %v5594_v36 = vld [vmem:[%s6319_s6 + $0x438] ss:$48 sps:$4 sm:$0xff]  }
  0xdf   : > { %3739 = vmatpush1.bf16.msra.mxu0 %v5461_v44  ;;  %3862 = vmatpush1.bf16.msra.mxu1 %v5464_v45  ;;  %v5525_v44 = vld [vmem:[%s6319_s6 + $0x10] ss:$48 sps:$4 sm:$0xff]   ;;  %v5533_v45 = vld [vmem:[%s6319_s6 + $0x74] ss:$48 sps:$4 sm:$0xff]  }
  0xe0   : > { %3740 = vmatprep.subr.bf16.mxu0 %v5469_v46  ;;  %3863 = vmatprep.subr.bf16.mxu1 %v5472_v47  ;;  %v5536_v46 = vld [vmem:[%s6319_s6 + $0x7c] ss:$48 sps:$4 sm:$0xff]   ;;  %v5531_v47 = vld [vmem:[%s6319_s6 + $0x70] ss:$48 sps:$4 sm:$0xff]  }
  0xe3   : > { %3741 = vmatpush1.bf16.msra.mxu0 %v5467_v49  ;;  %3864 = vmatpush1.bf16.msra.mxu1 %v5470_v50  ;;  %v5534_v49 = vld [vmem:[%s6319_s6 + $0x78] ss:$48 sps:$4 sm:$0xff]   ;;  %v5539_v50 = vld [vmem:[%s6319_s6 + $0xd4] ss:$48 sps:$4 sm:$0xff]  }
  0xe4   : > { %3742 = vmatprep.subr.bf16.mxu0 %v5475_v52  ;;  %3865 = vmatprep.subr.bf16.mxu1 %v5478_v53  ;;  %v5542_v52 = vld [vmem:[%s6319_s6 + $0xdc] ss:$48 sps:$4 sm:$0xff]   ;;  %v5537_v53 = vld [vmem:[%s6319_s6 + $0xd0] ss:$48 sps:$4 sm:$0xff]  }
  0xe7   : > { %3743 = vmatpush1.bf16.msra.mxu0 %v5473_v54  ;;  %3866 = vmatpush1.bf16.msra.mxu1 %v5476_v55  ;;  %v5540_v54 = vld [vmem:[%s6319_s6 + $0xd8] ss:$48 sps:$4 sm:$0xff]   ;;  %v5545_v55 = vld [vmem:[%s6319_s6 + $0x134] ss:$48 sps:$4 sm:$0xff]  }
  0xe8   : > { %3744 = vmatprep.subr.bf16.mxu0 %v5481_v56  ;;  %3867 = vmatprep.subr.bf16.mxu1 %v5484_v58  ;;  %v5548_v56 = vld [vmem:[%s6319_s6 + $0x13c] ss:$48 sps:$4 sm:$0xff]   ;;  %v5543_v58 = vld [vmem:[%s6319_s6 + $0x130] ss:$48 sps:$4 sm:$0xff]  }
  0xeb   : > { %3745 = vmatpush1.bf16.msra.mxu0 %v5479_v59  ;;  %3868 = vmatpush1.bf16.msra.mxu1 %v5482_v60  ;;  %v5546_v59 = vld [vmem:[%s6319_s6 + $0x138] ss:$48 sps:$4 sm:$0xff]   ;;  %v5551_v60 = vld [vmem:[%s6319_s6 + $0x194] ss:$48 sps:$4 sm:$0xff]  }
  0xec   : > { %3746 = vmatprep.subr.bf16.mxu0 %v5487_v61  ;;  %3869 = vmatprep.subr.bf16.mxu1 %v5490_v62  ;;  %v5554_v61 = vld [vmem:[%s6319_s6 + $0x19c] ss:$48 sps:$4 sm:$0xff]   ;;  %v5549_v62 = vld [vmem:[%s6319_s6 + $0x190] ss:$48 sps:$4 sm:$0xff]  }
  0xef   : > { %3747 = vmatpush1.bf16.msra.mxu0 %v5485_v63  ;;  %3870 = vmatpush1.bf16.msra.mxu1 %v5488_v0  ;;  %v5552_v63 = vld [vmem:[%s6319_s6 + $0x198] ss:$48 sps:$4 sm:$0xff]   ;;  %v5557_v0 = vld [vmem:[%s6319_s6 + $0x1f4] ss:$48 sps:$4 sm:$0xff]  }
  0xf0   : > { %3748 = vmatprep.subr.bf16.mxu0 %v5493_v1  ;;  %3871 = vmatprep.subr.bf16.mxu1 %v5496_v3  ;;  %v5560_v1 = vld [vmem:[%s6319_s6 + $0x1fc] ss:$48 sps:$4 sm:$0xff]   ;;  %v5555_v3 = vld [vmem:[%s6319_s6 + $0x1f0] ss:$48 sps:$4 sm:$0xff]  }
  0xf3   : > { %3749 = vmatpush1.bf16.msra.mxu0 %v5491_v4  ;;  %3872 = vmatpush1.bf16.msra.mxu1 %v5494_v5  ;;  %v5558_v4 = vld [vmem:[%s6319_s6 + $0x1f8] ss:$48 sps:$4 sm:$0xff]   ;;  %v5563_v5 = vld [vmem:[%s6319_s6 + $0x254] ss:$48 sps:$4 sm:$0xff]  }
  0xf4   : > { %3750 = vmatprep.subr.bf16.mxu0 %v5499_v7  ;;  %3873 = vmatprep.subr.bf16.mxu1 %v5502_v8  ;;  %v5566_v7 = vld [vmem:[%s6319_s6 + $0x25c] ss:$48 sps:$4 sm:$0xff]   ;;  %v5561_v8 = vld [vmem:[%s6319_s6 + $0x250] ss:$48 sps:$4 sm:$0xff]  }
  0xf7   : > { %3751 = vmatpush1.bf16.msra.mxu0 %v5497_v9  ;;  %3874 = vmatpush1.bf16.msra.mxu1 %v5500_v10  ;;  %v5564_v9 = vld [vmem:[%s6319_s6 + $0x258] ss:$48 sps:$4 sm:$0xff]   ;;  %v5569_v10 = vld [vmem:[%s6319_s6 + $0x2b4] ss:$48 sps:$4 sm:$0xff]  }
  0xf8   : > { %3752 = vmatprep.subr.bf16.mxu0 %v5505_v11  ;;  %3875 = vmatprep.subr.bf16.mxu1 %v5508_v12  ;;  %v5572_v11 = vld [vmem:[%s6319_s6 + $0x2bc] ss:$48 sps:$4 sm:$0xff]   ;;  %v5567_v12 = vld [vmem:[%s6319_s6 + $0x2b0] ss:$48 sps:$4 sm:$0xff]  }
  0xfb   : > { %3753 = vmatpush1.bf16.msra.mxu0 %v5503_v13  ;;  %3876 = vmatpush1.bf16.msra.mxu1 %v5506_v16  ;;  %v5570_v13 = vld [vmem:[%s6319_s6 + $0x2b8] ss:$48 sps:$4 sm:$0xff]   ;;  %v5575_v16 = vld [vmem:[%s6319_s6 + $0x314] ss:$48 sps:$4 sm:$0xff]  }
  0xfc   : > { %3754 = vmatprep.subr.bf16.mxu0 %v5511_v17  ;;  %3877 = vmatprep.subr.bf16.mxu1 %v5514_v19  ;;  %v5578_v17 = vld [vmem:[%s6319_s6 + $0x31c] ss:$48 sps:$4 sm:$0xff]   ;;  %v5573_v19 = vld [vmem:[%s6319_s6 + $0x310] ss:$48 sps:$4 sm:$0xff]  }
  0xff   : > { %3755 = vmatpush1.bf16.msra.mxu0 %v5509_v20  ;;  %3878 = vmatpush1.bf16.msra.mxu1 %v5512_v22  ;;  %v5576_v20 = vld [vmem:[%s6319_s6 + $0x318] ss:$48 sps:$4 sm:$0xff]   ;;  %v5581_v22 = vld [vmem:[%s6319_s6 + $0x374] ss:$48 sps:$4 sm:$0xff]  }
 0x100   : > { %3756 = vmatprep.subr.bf16.mxu0 %v5517_v23  ;;  %3879 = vmatprep.subr.bf16.mxu1 %v5520_v24  ;;  %v5584_v23 = vld [vmem:[%s6319_s6 + $0x37c] ss:$48 sps:$4 sm:$0xff]   ;;  %v5579_v24 = vld [vmem:[%s6319_s6 + $0x370] ss:$48 sps:$4 sm:$0xff]  }
 0x103   : > { %3757 = vmatpush1.bf16.msra.mxu0 %v5515_v28  ;;  %3880 = vmatpush1.bf16.msra.mxu1 %v5518_v30  ;;  %v5590_v28 = vld [vmem:[%s6319_s6 + $0x3dc] ss:$48 sps:$4 sm:$0xff]   ;;  %v5585_v30 = vld [vmem:[%s6319_s6 + $0x3d0] ss:$48 sps:$4 sm:$0xff]  }
 0x104   : > { %5124 = vmatprep.subr.msk.bf16.mxu0 %vm3613_vm1, %v5113_v31  ;;  %5126 = vmatprep.subr.msk.bf16.mxu1 %vm3613_vm1, %v5115_v32  ;;  %v5588_v31 = vld [vmem:[%s6319_s6 + $0x3d8] ss:$48 sps:$4 sm:$0xff]   ;;  %v5593_v32 = vld [vmem:[%s6319_s6 + $0x434] ss:$48 sps:$4 sm:$0xff]  }
 0x107   : > { %3759 = vmatpush1.bf16.msra.mxu0 %v3615_v39  ;;  %3882 = vmatpush1.bf16.msra.mxu1 %v3621_v40  ;;  %v5602_v39 = vld [vmem:[%s6319_s6 + $0x49c] ss:$48 sps:$4 sm:$0xff]   ;;  %v5597_v40 = vld [vmem:[%s6319_s6 + $0x490] ss:$48 sps:$4 sm:$0xff]  }
 0x108   : > { %3896 = vmatprep.subr.bf16.mxu0 %v5527_v37  ;;  %4019 = vmatprep.subr.bf16.mxu1 %v5530_v41  ;;  %v5599_v37 = vld [vmem:[%s6319_s6 + $0x494] ss:$48 sps:$4 sm:$0xff]   ;;  %v5600_v41 = vld [vmem:[%s6319_s6 + $0x498] ss:$48 sps:$4 sm:$0xff]  }
 0x10a   : > { %3765 = vmatmul.mubr.bf16.vlgmr.msra.gmra.mrb[0].mxu0 %v6577_v42  ;;  %3888 = vmatmul.mubr.bf16.vlgmr.msra.gmra.mrb[0].mxu1 %v6577_v42 }
 0x10b   : > { %3897 = vmatpush1.bf16.msra.mxu0 %v5525_v44  ;;  %4020 = vmatpush1.bf16.msra.mxu1 %v5528_v51  ;;  %v5605_v44 = vld [vmem:[%s6319_s6 + $0x4f4] ss:$48 sps:$4 sm:$0xff]   ;;  %v5608_v51 = vld [vmem:[%s6319_s6 + $0x4fc] ss:$48 sps:$4 sm:$0xff]  }
 0x10c   : > { %3898 = vmatprep.subr.bf16.mxu0 %v5533_v45  ;;  %4021 = vmatprep.subr.bf16.mxu1 %v5536_v46  ;;  %v5603_v45 = vld [vmem:[%s6319_s6 + $0x4f0] ss:$48 sps:$4 sm:$0xff]   ;;  %v5606_v46 = vld [vmem:[%s6319_s6 + $0x4f8] ss:$48 sps:$4 sm:$0xff]  }
 0x10d   : > { %3928 = vmatprep.mubr.bf16.mxu0 %v6395_v57  ;;  %4051 = vmatprep.mubr.bf16.mxu1 %v6395_v57 }
 0x10f   : > { %3899 = vmatpush1.bf16.msra.mxu0 %v5531_v47  ;;  %4022 = vmatpush1.bf16.msra.mxu1 %v5534_v49  ;;  %v5611_v47 = vld [vmem:[%s6319_s6 + $0x554] ss:$48 sps:$4 sm:$0xff]   ;;  %v5614_v49 = vld [vmem:[%s6319_s6 + $0x55c] ss:$48 sps:$4 sm:$0xff]  }
 0x110   : > { %3900 = vmatprep.subr.bf16.mxu0 %v5539_v50  ;;  %4023 = vmatprep.subr.bf16.mxu1 %v5542_v52  ;;  %v5609_v50 = vld [vmem:[%s6319_s6 + $0x550] ss:$48 sps:$4 sm:$0xff]   ;;  %v5612_v52 = vld [vmem:[%s6319_s6 + $0x558] ss:$48 sps:$4 sm:$0xff]  }
 0x113   : > { %3901 = vmatpush1.bf16.msra.mxu0 %v5537_v53  ;;  %4024 = vmatpush1.bf16.msra.mxu1 %v5540_v54  ;;  %v5617_v53 = vld [vmem:[%s6319_s6 + $0x5b4] ss:$48 sps:$4 sm:$0xff]   ;;  %v5620_v54 = vld [vmem:[%s6319_s6 + $0x5bc] ss:$48 sps:$4 sm:$0xff]  }
 0x114   : > { %3902 = vmatprep.subr.bf16.mxu0 %v5545_v55  ;;  %4025 = vmatprep.subr.bf16.mxu1 %v5548_v56  ;;  %v5615_v55 = vld [vmem:[%s6319_s6 + $0x5b0] ss:$48 sps:$4 sm:$0xff]   ;;  %v5618_v56 = vld [vmem:[%s6319_s6 + $0x5b8] ss:$48 sps:$4 sm:$0xff]  }
 0x117   : > { %3903 = vmatpush1.bf16.msra.mxu0 %v5543_v58  ;;  %4026 = vmatpush1.bf16.msra.mxu1 %v5546_v59  ;;  %v5623_v58 = vld [vmem:[%s6319_s6 + $0x614] ss:$48 sps:$4 sm:$0xff]   ;;  %v5626_v59 = vld [vmem:[%s6319_s6 + $0x61c] ss:$48 sps:$4 sm:$0xff]  }
 0x118   : > { %3904 = vmatprep.subr.bf16.mxu0 %v5551_v60  ;;  %4027 = vmatprep.subr.bf16.mxu1 %v5554_v61  ;;  %v5621_v60 = vld [vmem:[%s6319_s6 + $0x610] ss:$48 sps:$4 sm:$0xff]   ;;  %v5624_v61 = vld [vmem:[%s6319_s6 + $0x618] ss:$48 sps:$4 sm:$0xff]  }
 0x11b   : > { %3905 = vmatpush1.bf16.msra.mxu0 %v5549_v62  ;;  %4028 = vmatpush1.bf16.msra.mxu1 %v5552_v63  ;;  %v5629_v62 = vld [vmem:[%s6319_s6 + $0x674] ss:$48 sps:$4 sm:$0xff]   ;;  %v5632_v63 = vld [vmem:[%s6319_s6 + $0x67c] ss:$48 sps:$4 sm:$0xff]  }
 0x11c   : > { %3906 = vmatprep.subr.bf16.mxu0 %v5557_v0  ;;  %4029 = vmatprep.subr.bf16.mxu1 %v5560_v1  ;;  %v5627_v0 = vld [vmem:[%s6319_s6 + $0x670] ss:$48 sps:$4 sm:$0xff]   ;;  %v5630_v1 = vld [vmem:[%s6319_s6 + $0x678] ss:$48 sps:$4 sm:$0xff]  }
 0x11f   : > { %3907 = vmatpush1.bf16.msra.mxu0 %v5555_v3  ;;  %4030 = vmatpush1.bf16.msra.mxu1 %v5558_v4  ;;  %v5635_v3 = vld [vmem:[%s6319_s6 + $0x6d4] ss:$48 sps:$4 sm:$0xff]   ;;  %v5638_v4 = vld [vmem:[%s6319_s6 + $0x6dc] ss:$48 sps:$4 sm:$0xff]  }
 0x120   : > { %3908 = vmatprep.subr.bf16.mxu0 %v5563_v5  ;;  %4031 = vmatprep.subr.bf16.mxu1 %v5566_v7  ;;  %v5633_v5 = vld [vmem:[%s6319_s6 + $0x6d0] ss:$48 sps:$4 sm:$0xff]   ;;  %v5636_v7 = vld [vmem:[%s6319_s6 + $0x6d8] ss:$48 sps:$4 sm:$0xff]  }
 0x123   : > { %3909 = vmatpush1.bf16.msra.mxu0 %v5561_v8  ;;  %4032 = vmatpush1.bf16.msra.mxu1 %v5564_v9  ;;  %v5641_v8 = vld [vmem:[%s6319_s6 + $0x734] ss:$48 sps:$4 sm:$0xff]   ;;  %v5644_v9 = vld [vmem:[%s6319_s6 + $0x73c] ss:$48 sps:$4 sm:$0xff]  }
 0x124   : > { %3910 = vmatprep.subr.bf16.mxu0 %v5569_v10  ;;  %4033 = vmatprep.subr.bf16.mxu1 %v5572_v11  ;;  %v5639_v10 = vld [vmem:[%s6319_s6 + $0x730] ss:$48 sps:$4 sm:$0xff]   ;;  %v5642_v11 = vld [vmem:[%s6319_s6 + $0x738] ss:$48 sps:$4 sm:$0xff]  }
 0x127   : > { %3911 = vmatpush1.bf16.msra.mxu0 %v5567_v12  ;;  %4034 = vmatpush1.bf16.msra.mxu1 %v5570_v13  ;;  %v5647_v12 = vld [vmem:[%s6319_s6 + $0x794] ss:$48 sps:$4 sm:$0xff]   ;;  %v5650_v13 = vld [vmem:[%s6319_s6 + $0x79c] ss:$48 sps:$4 sm:$0xff]  }
 0x128   : > { %3912 = vmatprep.subr.bf16.mxu0 %v5575_v16  ;;  %4035 = vmatprep.subr.bf16.mxu1 %v5578_v17  ;;  %v5645_v16 = vld [vmem:[%s6319_s6 + $0x790] ss:$48 sps:$4 sm:$0xff]   ;;  %v5648_v17 = vld [vmem:[%s6319_s6 + $0x798] ss:$48 sps:$4 sm:$0xff]  }
 0x12b   : > { %3913 = vmatpush1.bf16.msra.mxu0 %v5573_v19  ;;  %4036 = vmatpush1.bf16.msra.mxu1 %v5576_v20  ;;  %v5653_v19 = vld [vmem:[%s6319_s6 + $0x7f4] ss:$48 sps:$4 sm:$0xff]   ;;  %v5656_v20 = vld [vmem:[%s6319_s6 + $0x7fc] ss:$48 sps:$4 sm:$0xff]  }
 0x12c   : > { %3914 = vmatprep.subr.bf16.mxu0 %v5581_v22  ;;  %4037 = vmatprep.subr.bf16.mxu1 %v5584_v23  ;;  %v5651_v22 = vld [vmem:[%s6319_s6 + $0x7f0] ss:$48 sps:$4 sm:$0xff]   ;;  %v5654_v23 = vld [vmem:[%s6319_s6 + $0x7f8] ss:$48 sps:$4 sm:$0xff]  }
 0x12f   : > { %3915 = vmatpush1.bf16.msra.mxu0 %v5579_v24  ;;  %4038 = vmatpush1.bf16.msra.mxu1 %v5582_v25  ;;  %v5659_v24 = vld [vmem:[%s6319_s6 + $0x854] ss:$48 sps:$4 sm:$0xff]   ;;  %v5662_v25 = vld [vmem:[%s6319_s6 + $0x85c] ss:$48 sps:$4 sm:$0xff]  }
 0x130   : > { %3916 = vmatprep.subr.bf16.mxu0 %v5587_v26  ;;  %4039 = vmatprep.subr.bf16.mxu1 %v5590_v28  ;;  %v5657_v26 = vld [vmem:[%s6319_s6 + $0x850] ss:$48 sps:$4 sm:$0xff]   ;;  %v5660_v28 = vld [vmem:[%s6319_s6 + $0x858] ss:$48 sps:$4 sm:$0xff]  }
 0x133   : > { %3917 = vmatpush1.bf16.msra.mxu0 %v5585_v30  ;;  %4040 = vmatpush1.bf16.msra.mxu1 %v5588_v31  ;;  %v5665_v30 = vld [vmem:[%s6319_s6 + $0x8b4] ss:$48 sps:$4 sm:$0xff]   ;;  %v5668_v31 = vld [vmem:[%s6319_s6 + $0x8bc] ss:$48 sps:$4 sm:$0xff]  }
 0x134   : > { %3918 = vmatprep.subr.bf16.mxu0 %v5593_v32  ;;  %4041 = vmatprep.subr.bf16.mxu1 %v5596_v34  ;;  %v5663_v32 = vld [vmem:[%s6319_s6 + $0x8b0] ss:$48 sps:$4 sm:$0xff]   ;;  %v5666_v34 = vld [vmem:[%s6319_s6 + $0x8b8] ss:$48 sps:$4 sm:$0xff]  }
 0x137   : > { %3919 = vmatpush1.bf16.msra.mxu0 %v5591_v35  ;;  %4042 = vmatpush1.bf16.msra.mxu1 %v5594_v36  ;;  %v5671_v35 = vld [vmem:[%s6319_s6 + $0x914] ss:$48 sps:$4 sm:$0xff]   ;;  %v5674_v36 = vld [vmem:[%s6319_s6 + $0x91c] ss:$48 sps:$4 sm:$0xff]  }
 0x138   : > { %3920 = vmatprep.subr.bf16.mxu0 %v5599_v37  ;;  %4043 = vmatprep.subr.bf16.mxu1 %v5602_v39  ;;  %v5669_v37 = vld [vmem:[%s6319_s6 + $0x910] ss:$48 sps:$4 sm:$0xff]   ;;  %v5672_v39 = vld [vmem:[%s6319_s6 + $0x918] ss:$48 sps:$4 sm:$0xff]  }
 0x13b   : > { %3921 = vmatpush1.bf16.msra.mxu0 %v5597_v40  ;;  %4044 = vmatpush1.bf16.msra.mxu1 %v5600_v41  ;;  %v5677_v40 = vld [vmem:[%s6319_s6 + $0x974] ss:$48 sps:$4 sm:$0xff]   ;;  %v5680_v41 = vld [vmem:[%s6319_s6 + $0x97c] ss:$48 sps:$4 sm:$0xff]  }
 0x13c   : > { %3922 = vmatprep.subr.bf16.mxu0 %v5605_v44  ;;  %4045 = vmatprep.subr.bf16.mxu1 %v5608_v51  ;;  %v5675_v44 = vld [vmem:[%s6319_s6 + $0x970] ss:$48 sps:$4 sm:$0xff]   ;;  %v5678_v51 = vld [vmem:[%s6319_s6 + $0x978] ss:$48 sps:$4 sm:$0xff]  }
 0x13f   : > { %3923 = vmatpush1.bf16.msra.mxu0 %v5603_v45  ;;  %4046 = vmatpush1.bf16.msra.mxu1 %v5606_v46  ;;  %v5683_v45 = vld [vmem:[%s6319_s6 + $0x9d4] ss:$48 sps:$4 sm:$0xff]   ;;  %v5686_v46 = vld [vmem:[%s6319_s6 + $0x9dc] ss:$48 sps:$4 sm:$0xff]  }
 0x140   : > { %3924 = vmatprep.subr.bf16.mxu0 %v5611_v47  ;;  %4047 = vmatprep.subr.bf16.mxu1 %v5614_v49  ;;  %v5681_v47 = vld [vmem:[%s6319_s6 + $0x9d0] ss:$48 sps:$4 sm:$0xff]   ;;  %v5684_v49 = vld [vmem:[%s6319_s6 + $0x9d8] ss:$48 sps:$4 sm:$0xff]  }
 0x143   : > { %3925 = vmatpush1.bf16.msra.mxu0 %v5609_v50  ;;  %4048 = vmatpush1.bf16.msra.mxu1 %v5612_v52  ;;  %v5689_v50 = vld [vmem:[%s6319_s6 + $0xa34] ss:$48 sps:$4 sm:$0xff]   ;;  %v5692_v52 = vld [vmem:[%s6319_s6 + $0xa3c] ss:$48 sps:$4 sm:$0xff]  }
 0x144   : > { %3926 = vmatprep.subr.bf16.mxu0 %v5617_v53  ;;  %4049 = vmatprep.subr.bf16.mxu1 %v5620_v54  ;;  %v5687_v53 = vld [vmem:[%s6319_s6 + $0xa30] ss:$48 sps:$4 sm:$0xff]   ;;  %v5690_v54 = vld [vmem:[%s6319_s6 + $0xa38] ss:$48 sps:$4 sm:$0xff]  }
 0x147   : > { %3927 = vmatpush1.bf16.msra.mxu0 %v5615_v55  ;;  %4050 = vmatpush1.bf16.msra.mxu1 %v5618_v56  ;;  %v5695_v55 = vld [vmem:[%s6319_s6 + $0xa94] ss:$48 sps:$4 sm:$0xff]   ;;  %v5698_v56 = vld [vmem:[%s6319_s6 + $0xa9c] ss:$48 sps:$4 sm:$0xff]  }
 0x148   : > { %3937 = vmatprep.subr.bf16.mxu0 %v5623_v58  ;;  %4060 = vmatprep.subr.bf16.mxu1 %v5626_v59  ;;  %v5693_v58 = vld [vmem:[%s6319_s6 + $0xa90] ss:$48 sps:$4 sm:$0xff]   ;;  %v5696_v59 = vld [vmem:[%s6319_s6 + $0xa98] ss:$48 sps:$4 sm:$0xff]  }
 0x14a   : > { %3929 = vmatmul.mubr.bf16.vlgmr.msra.gmra.mrb[4].mxu0 %v6425_v14  ;;  %4052 = vmatmul.mubr.bf16.vlgmr.msra.gmra.mrb[4].mxu1 %v6425_v14 }
 0x14b   : > { %3938 = vmatpush1.bf16.msra.mxu0 %v5621_v60  ;;  %4061 = vmatpush1.bf16.msra.mxu1 %v5624_v61  ;;  %v5701_v60 = vld [vmem:[%s6319_s6 + $0xaf4] ss:$48 sps:$4 sm:$0xff]   ;;  %v5704_v61 = vld [vmem:[%s6319_s6 + $0xafc] ss:$48 sps:$4 sm:$0xff]  }
 0x14c   : > { %3939 = vmatprep.subr.bf16.mxu0 %v5629_v62  ;;  %4062 = vmatprep.subr.bf16.mxu1 %v5632_v63  ;;  %v5699_v62 = vld [vmem:[%s6319_s6 + $0xaf0] ss:$48 sps:$4 sm:$0xff]   ;;  %v5702_v63 = vld [vmem:[%s6319_s6 + $0xaf8] ss:$48 sps:$4 sm:$0xff]  }
 0x14d   : > { %3969 = vmatprep.mubr.bf16.mxu0 %v6430_v18  ;;  %4092 = vmatprep.mubr.bf16.mxu1 %v6430_v18 }
 0x14f   : > { %3940 = vmatpush1.bf16.msra.mxu0 %v5627_v0  ;;  %4063 = vmatpush1.bf16.msra.mxu1 %v5630_v1  ;;  %v5707_v0 = vld [vmem:[%s6319_s6 + $0xb54] ss:$48 sps:$4 sm:$0xff]   ;;  %v5710_v1 = vld [vmem:[%s6319_s6 + $0xb5c] ss:$48 sps:$4 sm:$0xff]  }
 0x150   : > { %3941 = vmatprep.subr.bf16.mxu0 %v5635_v3  ;;  %4064 = vmatprep.subr.bf16.mxu1 %v5638_v4  ;;  %v5705_v3 = vld [vmem:[%s6319_s6 + $0xb50] ss:$48 sps:$4 sm:$0xff]   ;;  %v5708_v4 = vld [vmem:[%s6319_s6 + $0xb58] ss:$48 sps:$4 sm:$0xff]  }
 0x153   : > { %3942 = vmatpush1.bf16.msra.mxu0 %v5633_v5  ;;  %4065 = vmatpush1.bf16.msra.mxu1 %v5636_v7  ;;  %v5713_v5 = vld [vmem:[%s6319_s6 + $0xbb4] ss:$48 sps:$4 sm:$0xff]   ;;  %v5716_v7 = vld [vmem:[%s6319_s6 + $0xbbc] ss:$48 sps:$4 sm:$0xff]  }
 0x154   : > { %3943 = vmatprep.subr.bf16.mxu0 %v5641_v8  ;;  %4066 = vmatprep.subr.bf16.mxu1 %v5644_v9  ;;  %v5711_v8 = vld [vmem:[%s6319_s6 + $0xbb0] ss:$48 sps:$4 sm:$0xff]   ;;  %v5714_v9 = vld [vmem:[%s6319_s6 + $0xbb8] ss:$48 sps:$4 sm:$0xff]  }
 0x157   : > { %3944 = vmatpush1.bf16.msra.mxu0 %v5639_v10  ;;  %4067 = vmatpush1.bf16.msra.mxu1 %v5642_v11  ;;  %v5719_v10 = vld [vmem:[%s6319_s6 + $0xc14] ss:$48 sps:$4 sm:$0xff]   ;;  %v5722_v11 = vld [vmem:[%s6319_s6 + $0xc1c] ss:$48 sps:$4 sm:$0xff]  }
 0x158   : > { %3945 = vmatprep.subr.bf16.mxu0 %v5647_v12  ;;  %4068 = vmatprep.subr.bf16.mxu1 %v5650_v13  ;;  %v5717_v12 = vld [vmem:[%s6319_s6 + $0xc10] ss:$48 sps:$4 sm:$0xff]   ;;  %v5720_v13 = vld [vmem:[%s6319_s6 + $0xc18] ss:$48 sps:$4 sm:$0xff]  }
 0x15b   : > { %3946 = vmatpush1.bf16.msra.mxu0 %v5645_v16  ;;  %4069 = vmatpush1.bf16.msra.mxu1 %v5648_v17  ;;  %v5725_v16 = vld [vmem:[%s6319_s6 + $0xc74] ss:$48 sps:$4 sm:$0xff]   ;;  %v5728_v17 = vld [vmem:[%s6319_s6 + $0xc7c] ss:$48 sps:$4 sm:$0xff]  }
 0x15c   : > { %3947 = vmatprep.subr.bf16.mxu0 %v5653_v19  ;;  %4070 = vmatprep.subr.bf16.mxu1 %v5656_v20  ;;  %v5723_v19 = vld [vmem:[%s6319_s6 + $0xc70] ss:$48 sps:$4 sm:$0xff]   ;;  %v5726_v20 = vld [vmem:[%s6319_s6 + $0xc78] ss:$48 sps:$4 sm:$0xff]  }
 0x15f   : > { %3948 = vmatpush1.bf16.msra.mxu0 %v5651_v22  ;;  %4071 = vmatpush1.bf16.msra.mxu1 %v5654_v23  ;;  %v5731_v22 = vld [vmem:[%s6319_s6 + $0xcd4] ss:$48 sps:$4 sm:$0xff]   ;;  %v5734_v23 = vld [vmem:[%s6319_s6 + $0xcdc] ss:$48 sps:$4 sm:$0xff]  }
 0x160   : > { %3949 = vmatprep.subr.bf16.mxu0 %v5659_v24  ;;  %4072 = vmatprep.subr.bf16.mxu1 %v5662_v25  ;;  %v5729_v24 = vld [vmem:[%s6319_s6 + $0xcd0] ss:$48 sps:$4 sm:$0xff]   ;;  %v5732_v25 = vld [vmem:[%s6319_s6 + $0xcd8] ss:$48 sps:$4 sm:$0xff]  }
 0x163   : > { %3950 = vmatpush1.bf16.msra.mxu0 %v5657_v26  ;;  %4073 = vmatpush1.bf16.msra.mxu1 %v5660_v28  ;;  %v5737_v26 = vld [vmem:[%s6319_s6 + $0xd34] ss:$48 sps:$4 sm:$0xff]   ;;  %v5740_v28 = vld [vmem:[%s6319_s6 + $0xd3c] ss:$48 sps:$4 sm:$0xff]  }
 0x164   : > { %3951 = vmatprep.subr.bf16.mxu0 %v5665_v30  ;;  %4074 = vmatprep.subr.bf16.mxu1 %v5668_v31  ;;  %v5735_v30 = vld [vmem:[%s6319_s6 + $0xd30] ss:$48 sps:$4 sm:$0xff]   ;;  %v5738_v31 = vld [vmem:[%s6319_s6 + $0xd38] ss:$48 sps:$4 sm:$0xff]  }
 0x167   : > { %3952 = vmatpush1.bf16.msra.mxu0 %v5663_v32  ;;  %4075 = vmatpush1.bf16.msra.mxu1 %v5666_v34  ;;  %v5743_v32 = vld [vmem:[%s6319_s6 + $0xd94] ss:$48 sps:$4 sm:$0xff]   ;;  %v5746_v34 = vld [vmem:[%s6319_s6 + $0xd9c] ss:$48 sps:$4 sm:$0xff]  }
 0x168   : > { %3953 = vmatprep.subr.bf16.mxu0 %v5671_v35  ;;  %4076 = vmatprep.subr.bf16.mxu1 %v5674_v36  ;;  %v5741_v35 = vld [vmem:[%s6319_s6 + $0xd90] ss:$48 sps:$4 sm:$0xff]   ;;  %v5744_v36 = vld [vmem:[%s6319_s6 + $0xd98] ss:$48 sps:$4 sm:$0xff]  }
 0x16b   : > { %3954 = vmatpush1.bf16.msra.mxu0 %v5669_v37  ;;  %4077 = vmatpush1.bf16.msra.mxu1 %v5672_v39  ;;  %v5749_v37 = vld [vmem:[%s6319_s6 + $0xdf4] ss:$48 sps:$4 sm:$0xff]   ;;  %v5752_v39 = vld [vmem:[%s6319_s6 + $0xdfc] ss:$48 sps:$4 sm:$0xff]  }
 0x16c   : > { %3955 = vmatprep.subr.bf16.mxu0 %v5677_v40  ;;  %4078 = vmatprep.subr.bf16.mxu1 %v5680_v41  ;;  %v5747_v40 = vld [vmem:[%s6319_s6 + $0xdf0] ss:$48 sps:$4 sm:$0xff]   ;;  %v5750_v41 = vld [vmem:[%s6319_s6 + $0xdf8] ss:$48 sps:$4 sm:$0xff]  }
 0x16f   : > { %3956 = vmatpush1.bf16.msra.mxu0 %v5675_v44  ;;  %4079 = vmatpush1.bf16.msra.mxu1 %v5678_v51  ;;  %v5755_v44 = vld [vmem:[%s6319_s6 + $0xe54] ss:$48 sps:$4 sm:$0xff]   ;;  %v5758_v51 = vld [vmem:[%s6319_s6 + $0xe5c] ss:$48 sps:$4 sm:$0xff]  }
 0x170   : > { %3957 = vmatprep.subr.bf16.mxu0 %v5683_v45  ;;  %4080 = vmatprep.subr.bf16.mxu1 %v5686_v46  ;;  %v5753_v45 = vld [vmem:[%s6319_s6 + $0xe50] ss:$48 sps:$4 sm:$0xff]   ;;  %v5756_v46 = vld [vmem:[%s6319_s6 + $0xe58] ss:$48 sps:$4 sm:$0xff]  }
 0x173   : > { %3958 = vmatpush1.bf16.msra.mxu0 %v5681_v47  ;;  %4081 = vmatpush1.bf16.msra.mxu1 %v5684_v49  ;;  %v5761_v47 = vld [vmem:[%s6319_s6 + $0xeb4] ss:$48 sps:$4 sm:$0xff]   ;;  %v5764_v49 = vld [vmem:[%s6319_s6 + $0xebc] ss:$48 sps:$4 sm:$0xff]  }
 0x174   : > { %3959 = vmatprep.subr.bf16.mxu0 %v5689_v50  ;;  %4082 = vmatprep.subr.bf16.mxu1 %v5692_v52  ;;  %v5759_v50 = vld [vmem:[%s6319_s6 + $0xeb0] ss:$48 sps:$4 sm:$0xff]   ;;  %v5762_v52 = vld [vmem:[%s6319_s6 + $0xeb8] ss:$48 sps:$4 sm:$0xff]  }
 0x177   : > { %3960 = vmatpush1.bf16.msra.mxu0 %v5687_v53  ;;  %4083 = vmatpush1.bf16.msra.mxu1 %v5690_v54  ;;  %v5767_v53 = vld [vmem:[%s6319_s6 + $0xf14] ss:$48 sps:$4 sm:$0xff]   ;;  %v5770_v54 = vld [vmem:[%s6319_s6 + $0xf1c] ss:$48 sps:$4 sm:$0xff]  }
 0x178   : > { %3961 = vmatprep.subr.bf16.mxu0 %v5695_v55  ;;  %4084 = vmatprep.subr.bf16.mxu1 %v5698_v56  ;;  %v5765_v55 = vld [vmem:[%s6319_s6 + $0xf10] ss:$48 sps:$4 sm:$0xff]   ;;  %v5768_v56 = vld [vmem:[%s6319_s6 + $0xf18] ss:$48 sps:$4 sm:$0xff]  }
 0x17b   : > { %3962 = vmatpush1.bf16.msra.mxu0 %v5693_v58  ;;  %4085 = vmatpush1.bf16.msra.mxu1 %v5696_v59  ;;  %v5773_v58 = vld [vmem:[%s6319_s6 + $0xf74] ss:$48 sps:$4 sm:$0xff]   ;;  %v5776_v59 = vld [vmem:[%s6319_s6 + $0xf7c] ss:$48 sps:$4 sm:$0xff]  }
 0x17c   : > { %3963 = vmatprep.subr.bf16.mxu0 %v5701_v60  ;;  %4086 = vmatprep.subr.bf16.mxu1 %v5704_v61  ;;  %v5771_v60 = vld [vmem:[%s6319_s6 + $0xf70] ss:$48 sps:$4 sm:$0xff]   ;;  %v5774_v61 = vld [vmem:[%s6319_s6 + $0xf78] ss:$48 sps:$4 sm:$0xff]  }
 0x17f   : > { %3964 = vmatpush1.bf16.msra.mxu0 %v5699_v62  ;;  %4087 = vmatpush1.bf16.msra.mxu1 %v5702_v63  ;;  %v5779_v62 = vld [vmem:[%s6319_s6 + $0xfd4] ss:$48 sps:$4 sm:$0xff]   ;;  %v5782_v63 = vld [vmem:[%s6319_s6 + $0xfdc] ss:$48 sps:$4 sm:$0xff]  }
 0x180   : > { %3965 = vmatprep.subr.bf16.mxu0 %v5707_v0  ;;  %4088 = vmatprep.subr.bf16.mxu1 %v5710_v1  ;;  %v5777_v0 = vld [vmem:[%s6319_s6 + $0xfd0] ss:$48 sps:$4 sm:$0xff]   ;;  %v5780_v1 = vld [vmem:[%s6319_s6 + $0xfd8] ss:$48 sps:$4 sm:$0xff]  }
 0x183   : > { %3966 = vmatpush1.bf16.msra.mxu0 %v5705_v3  ;;  %4089 = vmatpush1.bf16.msra.mxu1 %v5708_v4  ;;  %v5785_v3 = vld [vmem:[%s6319_s6 + $0x1034] ss:$48 sps:$4 sm:$0xff]   ;;  %v5788_v4 = vld [vmem:[%s6319_s6 + $0x103c] ss:$48 sps:$4 sm:$0xff]  }
 0x184   : > { %3967 = vmatprep.subr.bf16.mxu0 %v5713_v5  ;;  %4090 = vmatprep.subr.bf16.mxu1 %v5716_v7  ;;  %v5783_v5 = vld [vmem:[%s6319_s6 + $0x1030] ss:$48 sps:$4 sm:$0xff]   ;;  %v5786_v7 = vld [vmem:[%s6319_s6 + $0x1038] ss:$48 sps:$4 sm:$0xff]  }
 0x187   : > { %3968 = vmatpush1.bf16.msra.mxu0 %v5711_v8  ;;  %4091 = vmatpush1.bf16.msra.mxu1 %v5714_v9  ;;  %v5791_v8 = vld [vmem:[%s6319_s6 + $0x1094] ss:$48 sps:$4 sm:$0xff]   ;;  %v5794_v9 = vld [vmem:[%s6319_s6 + $0x109c] ss:$48 sps:$4 sm:$0xff]  }
 0x188   : > { %3978 = vmatprep.subr.bf16.mxu0 %v5719_v10  ;;  %4101 = vmatprep.subr.bf16.mxu1 %v5722_v11  ;;  %v811_v10 = vld [vmem:[%s6319_s6 + $0x10f0] sm:$0xff]  ;;  %v812_v11 = vld [vmem:[%s6319_s6 + $0x10f8] sm:$0xff] }
 0x18a   : > { %3970 = vmatmul.mubr.bf16.vlgmr.msra.gmra.mrb[4].mxu0 %v6506_v29  ;;  %4093 = vmatmul.mubr.bf16.vlgmr.msra.gmra.mrb[4].mxu1 %v6506_v29 }
 0x18b   : > { %3979 = vmatpush1.bf16.msra.mxu0 %v5717_v12  ;;  %4102 = vmatpush1.bf16.msra.mxu1 %v5720_v13  ;;  %v5789_v12 = vld [vmem:[%s6319_s6 + $0x1090] ss:$48 sps:$4 sm:$0xff]   ;;  %v5792_v13 = vld [vmem:[%s6319_s6 + $0x1098] ss:$48 sps:$4 sm:$0xff]  }
 0x18c   : > { %3980 = vmatprep.subr.bf16.mxu0 %v5725_v16  ;;  %4103 = vmatprep.subr.bf16.mxu1 %v5728_v17  ;;  %v5117_v16 = vcombine.high %v811_v10, %v811_v10  ;;  %v5119_v17 = vcombine.high %v812_v11, %v812_v11 }
 0x18d   : > { %5129 = vmatprep.mubr.msk.bf16.mxu0 %vm3609_vm0, %v6511_v33  ;;  %5131 = vmatprep.mubr.msk.bf16.mxu1 %vm3609_vm0, %v6511_v33 }
 0x18f   : > { %3981 = vmatpush1.bf16.msra.mxu0 %v5723_v19  ;;  %4104 = vmatpush1.bf16.msra.mxu1 %v5726_v20  ;;  %v5116_v19 = vcombine.low %v811_v10, %v811_v10  ;;  %v5118_v20 = vcombine.low %v812_v11, %v812_v11  ;;  %v5852_v10 = vld [vmem:[%s6319_s6 + $0x32c] ss:$48 sps:$4 sm:$0xff]  }
 0x190   : > { %3982 = vmatprep.subr.bf16.mxu0 %v5731_v22  ;;  %4105 = vmatprep.subr.bf16.mxu1 %v5734_v23 }
 0x191   : > { %v3627_v22 = vsel %vm3613_vm1, %v5116_v19, 0  ;;  %v3633_v23 = vsel %vm3613_vm1, %v5118_v20, 0 }
 0x193   : > { %3983 = vmatpush1.bf16.msra.mxu0 %v5729_v24  ;;  %4106 = vmatpush1.bf16.msra.mxu1 %v5732_v25  ;;  %v5801_v24 = vld [vmem:[%s6319_s6 + $0x24] ss:$48 sps:$4 sm:$0xff]   ;;  %v5804_v25 = vld [vmem:[%s6319_s6 + $0x2c] ss:$48 sps:$4 sm:$0xff]  }
 0x194   : > { %3984 = vmatprep.subr.bf16.mxu0 %v5737_v26  ;;  %4107 = vmatprep.subr.bf16.mxu1 %v5740_v28  ;;  %v5799_v26 = vld [vmem:[%s6319_s6 + $0x20] ss:$48 sps:$4 sm:$0xff]   ;;  %v5802_v28 = vld [vmem:[%s6319_s6 + $0x28] ss:$48 sps:$4 sm:$0xff]  }
 0x197   : > { %3985 = vmatpush1.bf16.msra.mxu0 %v5735_v30  ;;  %4108 = vmatpush1.bf16.msra.mxu1 %v5738_v31  ;;  %v5807_v30 = vld [vmem:[%s6319_s6 + $0x84] ss:$48 sps:$4 sm:$0xff]   ;;  %v5810_v31 = vld [vmem:[%s6319_s6 + $0x8c] ss:$48 sps:$4 sm:$0xff]  }
 0x198   : > { %3986 = vmatprep.subr.bf16.mxu0 %v5743_v32  ;;  %4109 = vmatprep.subr.bf16.mxu1 %v5746_v34  ;;  %v5805_v32 = vld [vmem:[%s6319_s6 + $0x80] ss:$48 sps:$4 sm:$0xff]   ;;  %v5808_v34 = vld [vmem:[%s6319_s6 + $0x88] ss:$48 sps:$4 sm:$0xff]  }
 0x19b   : > { %3987 = vmatpush1.bf16.msra.mxu0 %v5741_v35  ;;  %4110 = vmatpush1.bf16.msra.mxu1 %v5744_v36  ;;  %v5813_v35 = vld [vmem:[%s6319_s6 + $0xe4] ss:$48 sps:$4 sm:$0xff]   ;;  %v5816_v36 = vld [vmem:[%s6319_s6 + $0xec] ss:$48 sps:$4 sm:$0xff]  }
 0x19c   : > { %3988 = vmatprep.subr.bf16.mxu0 %v5749_v37  ;;  %4111 = vmatprep.subr.bf16.mxu1 %v5752_v39  ;;  %v5811_v37 = vld [vmem:[%s6319_s6 + $0xe0] ss:$48 sps:$4 sm:$0xff]   ;;  %v5814_v39 = vld [vmem:[%s6319_s6 + $0xe8] ss:$48 sps:$4 sm:$0xff]  }
 0x19f   : > { %3989 = vmatpush1.bf16.msra.mxu0 %v5747_v40  ;;  %4112 = vmatpush1.bf16.msra.mxu1 %v5750_v41  ;;  %v5819_v40 = vld [vmem:[%s6319_s6 + $0x144] ss:$48 sps:$4 sm:$0xff]   ;;  %v5822_v41 = vld [vmem:[%s6319_s6 + $0x14c] ss:$48 sps:$4 sm:$0xff]  }
 0x1a0   : > { %3990 = vmatprep.subr.bf16.mxu0 %v5755_v44  ;;  %4113 = vmatprep.subr.bf16.mxu1 %v5758_v51  ;;  %v5817_v44 = vld [vmem:[%s6319_s6 + $0x140] ss:$48 sps:$4 sm:$0xff]   ;;  %v5820_v51 = vld [vmem:[%s6319_s6 + $0x148] ss:$48 sps:$4 sm:$0xff]  }
 0x1a3   : > { %3991 = vmatpush1.bf16.msra.mxu0 %v5753_v45  ;;  %4114 = vmatpush1.bf16.msra.mxu1 %v5756_v46  ;;  %v5828_v45 = vld [vmem:[%s6319_s6 + $0x1ac] ss:$48 sps:$4 sm:$0xff]   ;;  %v5823_v46 = vld [vmem:[%s6319_s6 + $0x1a0] ss:$48 sps:$4 sm:$0xff]  }
 0x1a4   : > { %3992 = vmatprep.subr.bf16.mxu0 %v5761_v47  ;;  %4115 = vmatprep.subr.bf16.mxu1 %v5764_v49  ;;  %v5826_v47 = vld [vmem:[%s6319_s6 + $0x1a8] ss:$48 sps:$4 sm:$0xff]   ;;  %v5831_v49 = vld [vmem:[%s6319_s6 + $0x204] ss:$48 sps:$4 sm:$0xff]  }
 0x1a7   : > { %3993 = vmatpush1.bf16.msra.mxu0 %v5759_v50  ;;  %4116 = vmatpush1.bf16.msra.mxu1 %v5762_v52  ;;  %v5834_v50 = vld [vmem:[%s6319_s6 + $0x20c] ss:$48 sps:$4 sm:$0xff]   ;;  %v5829_v52 = vld [vmem:[%s6319_s6 + $0x200] ss:$48 sps:$4 sm:$0xff]  }
 0x1a8   : > { %3994 = vmatprep.subr.bf16.mxu0 %v5767_v53  ;;  %4117 = vmatprep.subr.bf16.mxu1 %v5770_v54  ;;  %v5832_v53 = vld [vmem:[%s6319_s6 + $0x208] ss:$48 sps:$4 sm:$0xff]   ;;  %v5837_v54 = vld [vmem:[%s6319_s6 + $0x264] ss:$48 sps:$4 sm:$0xff]  }
 0x1ab   : > { %3995 = vmatpush1.bf16.msra.mxu0 %v5765_v55  ;;  %4118 = vmatpush1.bf16.msra.mxu1 %v5768_v56  ;;  %v5840_v55 = vld [vmem:[%s6319_s6 + $0x26c] ss:$48 sps:$4 sm:$0xff]   ;;  %v5835_v56 = vld [vmem:[%s6319_s6 + $0x260] ss:$48 sps:$4 sm:$0xff]  }
 0x1ac   : > { %3996 = vmatprep.subr.bf16.mxu0 %v5773_v58  ;;  %4119 = vmatprep.subr.bf16.mxu1 %v5776_v59  ;;  %v5838_v58 = vld [vmem:[%s6319_s6 + $0x268] ss:$48 sps:$4 sm:$0xff]   ;;  %v6810_v59 = vld [vmem:[%s6325_s30] sm:$0xff] }
 0x1af   : > { %3997 = vmatpush1.bf16.msra.mxu0 %v5771_v60  ;;  %4120 = vmatpush1.bf16.msra.mxu1 %v5774_v61  ;;  %v6177_v60 = vmov 1966171168  }
 0x1b0   : > { %3998 = vmatprep.subr.bf16.mxu0 %v5779_v62  ;;  %4121 = vmatprep.subr.bf16.mxu1 %v5782_v63  ;;  %v4405_v61 = vunpack.c.l.s4 %v6177_v60  ;;  %v5843_v62 = vld [vmem:[%s6319_s6 + $0x2c4] ss:$48 sps:$4 sm:$0xff]   ;;  %v5846_v63 = vld [vmem:[%s6319_s6 + $0x2cc] ss:$48 sps:$4 sm:$0xff]  }
 0x1b1   : > { %v5882_v60 = vld [vmem:[%s6319_s6 + $0x50c] ss:$48 sps:$4 sm:$0xff]  }
 0x1b3   : > { %3999 = vmatpush1.bf16.msra.mxu0 %v5777_v0  ;;  %4122 = vmatpush1.bf16.msra.mxu1 %v5780_v1  ;;  %v3552_v0 = vrot.slane %v6810_v59, %v6408_v2  ;;  %v3560_v1 = vrot.slane %v6810_v59, %v6489_v15 }
 0x1b4   : > { %4000 = vmatprep.subr.bf16.mxu0 %v5785_v3  ;;  %4123 = vmatprep.subr.bf16.mxu1 %v5788_v4  ;;  %v3556_v3 = vrot.slane %v6810_v59, %v6381_v48  ;;  %v4406_v4 = vunpack.c.0.s8 %v4405_v61  ;;  %v5877_v61 = vld [vmem:[%s6319_s6 + $0x500] ss:$48 sps:$4 sm:$0xff]  }
 0x1b7   : > { %4001 = vmatpush1.bf16.msra.mxu0 %v5783_v5  ;;  %4124 = vmatpush1.bf16.msra.mxu1 %v5786_v7  ;;  %v3564_v5 = vrot.slane %v6810_v59, %v6414_v6  ;;  %v5841_v7 = vld [vmem:[%s6319_s6 + $0x2c0] ss:$48 sps:$4 sm:$0xff]  }
 0x1b8   : > { %4002 = vmatprep.subr.bf16.mxu0 %v5791_v8  ;;  %4125 = vmatprep.subr.bf16.mxu1 %v5794_v9  ;;  %v5844_v8 = vld [vmem:[%s6319_s6 + $0x2c8] ss:$48 sps:$4 sm:$0xff]   ;;  %v5849_v9 = vld [vmem:[%s6319_s6 + $0x324] ss:$48 sps:$4 sm:$0xff]  }
 0x1bb   : > { %4003 = vmatpush1.bf16.msra.mxu0 %v5789_v12  ;;  %4126 = vmatpush1.bf16.msra.mxu1 %v5792_v13 }
 0x1bc   : > { %5128 = vmatprep.subr.msk.bf16.mxu0 %vm3613_vm1, %v5117_v16  ;;  %5130 = vmatprep.subr.msk.bf16.mxu1 %vm3613_vm1, %v5119_v17 }
 0x1bf   : > { %4005 = vmatpush1.bf16.msra.mxu0 %v3627_v22  ;;  %4128 = vmatpush1.bf16.msra.mxu1 %v3633_v23  ;;  %v6827_v22 = vsub.s32 %v4406_v4, %v6374_v43  ;;  %v5891_v4 = vld [vmem:[%s6319_s6 + $0x5c4] ss:$48 sps:$4 sm:$0xff]  }
 0x1c0   : > { %4142 = vmatprep.subr.bf16.mxu0 %v5801_v24  ;;  %4265 = vmatprep.subr.bf16.mxu1 %v5804_v25 }
 0x1c2   : > { %4011 = vmatmul.mubr.bf16.vlgmr.msra.gmra.mrb[4].mxu0 %v6577_v42  ;;  %4134 = vmatmul.mubr.bf16.vlgmr.msra.gmra.mrb[4].mxu1 %v6577_v42 }
 0x1c3   : > { %4143 = vmatpush1.bf16.msra.mxu0 %v5799_v26  ;;  %4266 = vmatpush1.bf16.msra.mxu1 %v5802_v28  ;;  %v5847_v26 = vld [vmem:[%s6319_s6 + $0x320] ss:$48 sps:$4 sm:$0xff]   ;;  %v5850_v28 = vld [vmem:[%s6319_s6 + $0x328] ss:$48 sps:$4 sm:$0xff]  }
 0x1c4   : > { %4144 = vmatprep.subr.bf16.mxu0 %v5807_v30  ;;  %4267 = vmatprep.subr.bf16.mxu1 %v5810_v31 }
 0x1c5   : > { %4174 = vmatprep.mubr.bf16.mxu0 %v6395_v57  ;;  %4297 = vmatprep.mubr.bf16.mxu1 %v6395_v57  ;;  %v5825_v57 = vld [vmem:[%s6319_s6 + $0x1a4] ss:$48 sps:$4 sm:$0xff]  }
 0x1c7   : > { %4145 = vmatpush1.bf16.msra.mxu0 %v5805_v32  ;;  %4268 = vmatpush1.bf16.msra.mxu1 %v5808_v34  ;;  %v5855_v32 = vld [vmem:[%s6319_s6 + $0x384] ss:$48 sps:$4 sm:$0xff]   ;;  %v5858_v34 = vld [vmem:[%s6319_s6 + $0x38c] ss:$48 sps:$4 sm:$0xff]  }
 0x1c8   : > { %4146 = vmatprep.subr.bf16.mxu0 %v5813_v35  ;;  %4269 = vmatprep.subr.bf16.mxu1 %v5816_v36 }
 0x1cb   : > { %4147 = vmatpush1.bf16.msra.mxu0 %v5811_v37  ;;  %4270 = vmatpush1.bf16.msra.mxu1 %v5814_v39 }
 0x1cc   : > { %4148 = vmatprep.subr.bf16.mxu0 %v5819_v40  ;;  %4271 = vmatprep.subr.bf16.mxu1 %v5822_v41  ;;  %v5853_v40 = vld [vmem:[%s6319_s6 + $0x380] ss:$48 sps:$4 sm:$0xff]   ;;  %v5856_v41 = vld [vmem:[%s6319_s6 + $0x388] ss:$48 sps:$4 sm:$0xff]  }
 0x1cf   : > { %4149 = vmatpush1.bf16.msra.mxu0 %v5817_v44  ;;  %4272 = vmatpush1.bf16.msra.mxu1 %v5820_v51  ;;  %v5861_v44 = vld [vmem:[%s6319_s6 + $0x3e4] ss:$48 sps:$4 sm:$0xff]   ;;  %v5864_v51 = vld [vmem:[%s6319_s6 + $0x3ec] ss:$48 sps:$4 sm:$0xff]  }
 0x1d0   : > { %4150 = vmatprep.subr.bf16.mxu0 %v5825_v57  ;;  %4273 = vmatprep.subr.bf16.mxu1 %v5828_v45  ;;  %v5859_v45 = vld [vmem:[%s6319_s6 + $0x3e0] ss:$48 sps:$4 sm:$0xff]  }
 0x1d3   : > { %4151 = vmatpush1.bf16.msra.mxu0 %v5823_v46  ;;  %4274 = vmatpush1.bf16.msra.mxu1 %v5826_v47  ;;  %v5862_v46 = vld [vmem:[%s6319_s6 + $0x3e8] ss:$48 sps:$4 sm:$0xff]   ;;  %v5867_v47 = vld [vmem:[%s6319_s6 + $0x444] ss:$48 sps:$4 sm:$0xff]  }
 0x1d4   : > { %4152 = vmatprep.subr.bf16.mxu0 %v5831_v49  ;;  %4275 = vmatprep.subr.bf16.mxu1 %v5834_v50  ;;  %v5870_v49 = vld [vmem:[%s6319_s6 + $0x44c] ss:$48 sps:$4 sm:$0xff]   ;;  %v5865_v50 = vld [vmem:[%s6319_s6 + $0x440] ss:$48 sps:$4 sm:$0xff]  }
 0x1d7   : > { %4153 = vmatpush1.bf16.msra.mxu0 %v5829_v52  ;;  %4276 = vmatpush1.bf16.msra.mxu1 %v5832_v53  ;;  %v5868_v52 = vld [vmem:[%s6319_s6 + $0x448] ss:$48 sps:$4 sm:$0xff]   ;;  %v5873_v53 = vld [vmem:[%s6319_s6 + $0x4a4] ss:$48 sps:$4 sm:$0xff]  }
 0x1d8   : > { %4154 = vmatprep.subr.bf16.mxu0 %v5837_v54  ;;  %4277 = vmatprep.subr.bf16.mxu1 %v5840_v55  ;;  %v5876_v54 = vld [vmem:[%s6319_s6 + $0x4ac] ss:$48 sps:$4 sm:$0xff]   ;;  %v5871_v55 = vld [vmem:[%s6319_s6 + $0x4a0] ss:$48 sps:$4 sm:$0xff]  }
 0x1db   : > { %4155 = vmatpush1.bf16.msra.mxu0 %v5835_v56  ;;  %4278 = vmatpush1.bf16.msra.mxu1 %v5838_v58  ;;  %v5874_v56 = vld [vmem:[%s6319_s6 + $0x4a8] ss:$48 sps:$4 sm:$0xff]   ;;  %v5879_v58 = vld [vmem:[%s6319_s6 + $0x504] ss:$48 sps:$4 sm:$0xff]  }
 0x1dc   : > { %4156 = vmatprep.subr.bf16.mxu0 %v5843_v62  ;;  %4279 = vmatprep.subr.bf16.mxu1 %v5846_v63  ;;  %v5880_v62 = vld [vmem:[%s6319_s6 + $0x508] ss:$48 sps:$4 sm:$0xff]   ;;  %v5885_v63 = vld [vmem:[%s6319_s6 + $0x564] ss:$48 sps:$4 sm:$0xff]  }
 0x1dd   : > { %v3766_v11 = vpop.f32.mrb[0].mxu0  ;;  %v3889_v12 = vpop.f32.mrb[0].mxu1 }
 0x1de   : > { %v5139_v13 = vadd.f32 %v3766_v11, %v3552_v0  ;;  %v5141_v16 = vadd.f32 %v3889_v12, %v3560_v1  ;;  %v3768_v17 = vpop.f32.mrb[1].mxu0  ;;  %v3891_v19 = vpop.f32.mrb[1].mxu1  ;;  %v5888_v0 = vld [vmem:[%s6319_s6 + $0x56c] ss:$48 sps:$4 sm:$0xff]   ;;  %v5883_v1 = vld [vmem:[%s6319_s6 + $0x560] ss:$48 sps:$4 sm:$0xff]  }
 0x1df   : > { %v5140_v20 = vadd.f32 %v3768_v17, %v3556_v3  ;;  %v5142_v23 = vadd.f32 %v3891_v19, %v3564_v5  ;;  %v3770_v24 = vpop.f32.mrb[2].mxu0  ;;  %v3893_v25 = vpop.f32.mrb[2].mxu1  ;;  %4157 = vmatpush1.bf16.msra.mxu0 %v5841_v7  ;;  %4280 = vmatpush1.bf16.msra.mxu1 %v5844_v8  ;;  %v5886_v3 = vld [vmem:[%s6319_s6 + $0x568] ss:$48 sps:$4 sm:$0xff]   ;;  %v5894_v5 = vld [vmem:[%s6319_s6 + $0x5cc] ss:$48 sps:$4 sm:$0xff]  }
 0x1e0   : > { %v3771_v30 = vpop.f32.mrb[3].mxu0  ;;  %v3894_v31 = vpop.f32.mrb[3].mxu1  ;;  %4158 = vmatprep.subr.bf16.mxu0 %v5849_v9  ;;  %4281 = vmatprep.subr.bf16.mxu1 %v5852_v10  ;;  %v5889_v7 = vld [vmem:[%s6319_s6 + $0x5c0] ss:$48 sps:$4 sm:$0xff]   ;;  %v5892_v8 = vld [vmem:[%s6319_s6 + $0x5c8] ss:$48 sps:$4 sm:$0xff]  }
 0x1e1   : > { %v4400_v35 = vcombine.low %v5139_v13, %v5140_v20  ;;  %v4401_v36 = vcombine.low %v5141_v16, %v5142_v23  ;;  %v5897_v9 = vld [vmem:[%s6319_s6 + $0x624] ss:$48 sps:$4 sm:$0xff]   ;;  %v5900_v10 = vld [vmem:[%s6319_s6 + $0x62c] ss:$48 sps:$4 sm:$0xff]   ;;  %v5895_v11 = vld [vmem:[%s6319_s6 + $0x620] ss:$48 sps:$4 sm:$0xff]  }
 0x1e2   : > { %v5898_v12 = vld [vmem:[%s6319_s6 + $0x628] ss:$48 sps:$4 sm:$0xff]   ;;  %v5903_v13 = vld [vmem:[%s6319_s6 + $0x684] ss:$48 sps:$4 sm:$0xff]   ;;  %v5906_v16 = vld [vmem:[%s6319_s6 + $0x68c] ss:$48 sps:$4 sm:$0xff]  }
 0x1e3   : > { %v6834_v37 = vrot.slane %v4400_v35, %v6827_v22  ;;  %v6837_v39 = vrot.slane %v4401_v36, %v6827_v22  ;;  %4159 = vmatpush1.bf16.msra.mxu0 %v5847_v26  ;;  %4282 = vmatpush1.bf16.msra.mxu1 %v5850_v28  ;;  %v5901_v17 = vld [vmem:[%s6319_s6 + $0x680] ss:$48 sps:$4 sm:$0xff]   ;;  %v5904_v19 = vld [vmem:[%s6319_s6 + $0x688] ss:$48 sps:$4 sm:$0xff]   ;;  %v5909_v20 = vld [vmem:[%s6319_s6 + $0x6e4] ss:$48 sps:$4 sm:$0xff]  }
 0x1e4   : > { %4160 = vmatprep.subr.bf16.mxu0 %v5855_v32  ;;  %4283 = vmatprep.subr.bf16.mxu1 %v5858_v34  ;;  %v5912_v23 = vld [vmem:[%s6319_s6 + $0x6ec] ss:$48 sps:$4 sm:$0xff]   ;;  %v5910_v24 = vld [vmem:[%s6319_s6 + $0x6e8] ss:$48 sps:$4 sm:$0xff]   ;;  %v5915_v25 = vld [vmem:[%s6319_s6 + $0x744] ss:$48 sps:$4 sm:$0xff]  }
 0x1e5   : > { %v4432_v57 = vcombine.low %v6834_v37, %v6837_v39  ;;  %v5918_v26 = vld [vmem:[%s6319_s6 + $0x74c] ss:$48 sps:$4 sm:$0xff]   ;;  %v5913_v28 = vld [vmem:[%s6319_s6 + $0x740] ss:$48 sps:$4 sm:$0xff]   ;;  %v5916_v30 = vld [vmem:[%s6319_s6 + $0x748] ss:$48 sps:$4 sm:$0xff]  }
 0x1e6   : > { %v5924_v31 = vld [vmem:[%s6319_s6 + $0x7ac] ss:$48 sps:$4 sm:$0xff]   ;;  %v5919_v32 = vld [vmem:[%s6319_s6 + $0x7a0] ss:$48 sps:$4 sm:$0xff]   ;;  %v5922_v34 = vld [vmem:[%s6319_s6 + $0x7a8] ss:$48 sps:$4 sm:$0xff]  }
 0x1e7   : > { %4161 = vmatpush1.bf16.msra.mxu0 %v5853_v40  ;;  %4284 = vmatpush1.bf16.msra.mxu1 %v5856_v41  ;;  %v5927_v35 = vld [vmem:[%s6319_s6 + $0x804] ss:$48 sps:$4 sm:$0xff]   ;;  %v5930_v36 = vld [vmem:[%s6319_s6 + $0x80c] ss:$48 sps:$4 sm:$0xff]   ;;  %v5925_v40 = vld [vmem:[%s6319_s6 + $0x800] ss:$48 sps:$4 sm:$0xff]  }
 0x1e8   : > { %4162 = vmatprep.subr.bf16.mxu0 %v5861_v44  ;;  %4285 = vmatprep.subr.bf16.mxu1 %v5864_v51  ;;  %v5928_v41 = vld [vmem:[%s6319_s6 + $0x808] ss:$48 sps:$4 sm:$0xff]   ;;  %v5933_v44 = vld [vmem:[%s6319_s6 + $0x864] ss:$48 sps:$4 sm:$0xff]   ;;  %v5936_v51 = vld [vmem:[%s6319_s6 + $0x86c] ss:$48 sps:$4 sm:$0xff]  }
 0x1eb   : > { %4163 = vmatpush1.bf16.msra.mxu0 %v5859_v45  ;;  %4286 = vmatpush1.bf16.msra.mxu1 %v5862_v46  ;;  %v5931_v45 = vld [vmem:[%s6319_s6 + $0x860] ss:$48 sps:$4 sm:$0xff]   ;;  %v5934_v46 = vld [vmem:[%s6319_s6 + $0x868] ss:$48 sps:$4 sm:$0xff]  }
 0x1ec   : > { %4164 = vmatprep.subr.bf16.mxu0 %v5867_v47  ;;  %4287 = vmatprep.subr.bf16.mxu1 %v5870_v49  ;;  %v5939_v47 = vld [vmem:[%s6319_s6 + $0x8c4] ss:$48 sps:$4 sm:$0xff]   ;;  %v5942_v49 = vld [vmem:[%s6319_s6 + $0x8cc] ss:$48 sps:$4 sm:$0xff]  }
 0x1ef   : > { %4165 = vmatpush1.bf16.msra.mxu0 %v5865_v50  ;;  %4288 = vmatpush1.bf16.msra.mxu1 %v5868_v52  ;;  %v5937_v50 = vld [vmem:[%s6319_s6 + $0x8c0] ss:$48 sps:$4 sm:$0xff]   ;;  %v5940_v52 = vld [vmem:[%s6319_s6 + $0x8c8] ss:$48 sps:$4 sm:$0xff]  }
 0x1f0   : > { %4166 = vmatprep.subr.bf16.mxu0 %v5873_v53  ;;  %4289 = vmatprep.subr.bf16.mxu1 %v5876_v54  ;;  %v5945_v53 = vld [vmem:[%s6319_s6 + $0x924] ss:$48 sps:$4 sm:$0xff]   ;;  %v5948_v54 = vld [vmem:[%s6319_s6 + $0x92c] ss:$48 sps:$4 sm:$0xff]  }
 0x1f3   : > { %4167 = vmatpush1.bf16.msra.mxu0 %v5871_v55  ;;  %4290 = vmatpush1.bf16.msra.mxu1 %v5874_v56  ;;  %v5943_v55 = vld [vmem:[%s6319_s6 + $0x920] ss:$48 sps:$4 sm:$0xff]   ;;  %v5946_v56 = vld [vmem:[%s6319_s6 + $0x928] ss:$48 sps:$4 sm:$0xff]  }
 0x1f4   : > { %4168 = vmatprep.subr.bf16.mxu0 %v5879_v58  ;;  %4291 = vmatprep.subr.bf16.mxu1 %v5882_v60  ;;  %v5951_v58 = vld [vmem:[%s6319_s6 + $0x984] ss:$48 sps:$4 sm:$0xff]   ;;  %v5954_v60 = vld [vmem:[%s6319_s6 + $0x98c] ss:$48 sps:$4 sm:$0xff]  }
 0x1f7   : > { %4169 = vmatpush1.bf16.msra.mxu0 %v5877_v61  ;;  %4292 = vmatpush1.bf16.msra.mxu1 %v5880_v62  ;;  %v5949_v61 = vld [vmem:[%s6319_s6 + $0x980] ss:$48 sps:$4 sm:$0xff]   ;;  %v5952_v62 = vld [vmem:[%s6319_s6 + $0x988] ss:$48 sps:$4 sm:$0xff]  }
 0x1f8   : > { %4170 = vmatprep.subr.bf16.mxu0 %v5885_v63  ;;  %4293 = vmatprep.subr.bf16.mxu1 %v5888_v0  ;;  %v5957_v63 = vld [vmem:[%s6319_s6 + $0x9e4] ss:$48 sps:$4 sm:$0xff]   ;;  %v5960_v0 = vld [vmem:[%s6319_s6 + $0x9ec] ss:$48 sps:$4 sm:$0xff]  }
 0x1fb   : > { %4171 = vmatpush1.bf16.msra.mxu0 %v5883_v1  ;;  %4294 = vmatpush1.bf16.msra.mxu1 %v5886_v3  ;;  %v5955_v1 = vld [vmem:[%s6319_s6 + $0x9e0] ss:$48 sps:$4 sm:$0xff]   ;;  %v5958_v3 = vld [vmem:[%s6319_s6 + $0x9e8] ss:$48 sps:$4 sm:$0xff]  }
 0x1fc   : > { %4172 = vmatprep.subr.bf16.mxu0 %v5891_v4  ;;  %4295 = vmatprep.subr.bf16.mxu1 %v5894_v5  ;;  %v5963_v4 = vld [vmem:[%s6319_s6 + $0xa44] ss:$48 sps:$4 sm:$0xff]   ;;  %v5966_v5 = vld [vmem:[%s6319_s6 + $0xa4c] ss:$48 sps:$4 sm:$0xff]  }
 0x1ff   : > { %4173 = vmatpush1.bf16.msra.mxu0 %v5889_v7  ;;  %4296 = vmatpush1.bf16.msra.mxu1 %v5892_v8  ;;  %v5961_v7 = vld [vmem:[%s6319_s6 + $0xa40] ss:$48 sps:$4 sm:$0xff]   ;;  %v5964_v8 = vld [vmem:[%s6319_s6 + $0xa48] ss:$48 sps:$4 sm:$0xff]  }
 0x200   : > { %4183 = vmatprep.subr.bf16.mxu0 %v5897_v9  ;;  %4306 = vmatprep.subr.bf16.mxu1 %v5900_v10  ;;  %v5969_v9 = vld [vmem:[%s6319_s6 + $0xaa4] ss:$48 sps:$4 sm:$0xff]   ;;  %v5972_v10 = vld [vmem:[%s6319_s6 + $0xaac] ss:$48 sps:$4 sm:$0xff]  }
 0x202   : > { %4175 = vmatmul.mubr.bf16.vlgmr.msra.gmra.mrb[8].mxu0 %v6425_v14  ;;  %4298 = vmatmul.mubr.bf16.vlgmr.msra.gmra.mrb[8].mxu1 %v6425_v14  ;;  %v5907_v14 = vld [vmem:[%s6319_s6 + $0x6e0] ss:$48 sps:$4 sm:$0xff]  }
 0x203   : > { %4184 = vmatpush1.bf16.msra.mxu0 %v5895_v11  ;;  %4307 = vmatpush1.bf16.msra.mxu1 %v5898_v12  ;;  %v5967_v11 = vld [vmem:[%s6319_s6 + $0xaa0] ss:$48 sps:$4 sm:$0xff]   ;;  %v5970_v12 = vld [vmem:[%s6319_s6 + $0xaa8] ss:$48 sps:$4 sm:$0xff]  }
 0x204   : > { %4185 = vmatprep.subr.bf16.mxu0 %v5903_v13  ;;  %4308 = vmatprep.subr.bf16.mxu1 %v5906_v16  ;;  %v5975_v13 = vld [vmem:[%s6319_s6 + $0xb04] ss:$48 sps:$4 sm:$0xff]   ;;  %v5978_v16 = vld [vmem:[%s6319_s6 + $0xb0c] ss:$48 sps:$4 sm:$0xff]  }
 0x205   : > { %4215 = vmatprep.mubr.bf16.mxu0 %v6430_v18  ;;  %4338 = vmatprep.mubr.bf16.mxu1 %v6430_v18  ;;  %v5921_v18 = vld [vmem:[%s6319_s6 + $0x7a4] ss:$48 sps:$4 sm:$0xff]  }
 0x207   : > { %4186 = vmatpush1.bf16.msra.mxu0 %v5901_v17  ;;  %4309 = vmatpush1.bf16.msra.mxu1 %v5904_v19  ;;  %v5973_v17 = vld [vmem:[%s6319_s6 + $0xb00] ss:$48 sps:$4 sm:$0xff]   ;;  %v5976_v19 = vld [vmem:[%s6319_s6 + $0xb08] ss:$48 sps:$4 sm:$0xff]  }
 0x208   : > { %4187 = vmatprep.subr.bf16.mxu0 %v5909_v20  ;;  %4310 = vmatprep.subr.bf16.mxu1 %v5912_v23  ;;  %v5981_v20 = vld [vmem:[%s6319_s6 + $0xb64] ss:$48 sps:$4 sm:$0xff]   ;;  %v5984_v23 = vld [vmem:[%s6319_s6 + $0xb6c] ss:$48 sps:$4 sm:$0xff]  }
 0x20b   : > { %4188 = vmatpush1.bf16.msra.mxu0 %v5907_v14  ;;  %4311 = vmatpush1.bf16.msra.mxu1 %v5910_v24  ;;  %v5979_v14 = vld [vmem:[%s6319_s6 + $0xb60] ss:$48 sps:$4 sm:$0xff]   ;;  %v5982_v24 = vld [vmem:[%s6319_s6 + $0xb68] ss:$48 sps:$4 sm:$0xff]  }
 0x20c   : > { %4189 = vmatprep.subr.bf16.mxu0 %v5915_v25  ;;  %4312 = vmatprep.subr.bf16.mxu1 %v5918_v26  ;;  %v5987_v25 = vld [vmem:[%s6319_s6 + $0xbc4] ss:$48 sps:$4 sm:$0xff]   ;;  %v5990_v26 = vld [vmem:[%s6319_s6 + $0xbcc] ss:$48 sps:$4 sm:$0xff]  }
 0x20f   : > { %4190 = vmatpush1.bf16.msra.mxu0 %v5913_v28  ;;  %4313 = vmatpush1.bf16.msra.mxu1 %v5916_v30  ;;  %v5985_v28 = vld [vmem:[%s6319_s6 + $0xbc0] ss:$48 sps:$4 sm:$0xff]   ;;  %v5988_v30 = vld [vmem:[%s6319_s6 + $0xbc8] ss:$48 sps:$4 sm:$0xff]  }
 0x210   : > { %4191 = vmatprep.subr.bf16.mxu0 %v5921_v18  ;;  %4314 = vmatprep.subr.bf16.mxu1 %v5924_v31  ;;  %v5993_v18 = vld [vmem:[%s6319_s6 + $0xc24] ss:$48 sps:$4 sm:$0xff]   ;;  %v5996_v31 = vld [vmem:[%s6319_s6 + $0xc2c] ss:$48 sps:$4 sm:$0xff]  }
 0x213   : > { %4192 = vmatpush1.bf16.msra.mxu0 %v5919_v32  ;;  %4315 = vmatpush1.bf16.msra.mxu1 %v5922_v34  ;;  %v5991_v32 = vld [vmem:[%s6319_s6 + $0xc20] ss:$48 sps:$4 sm:$0xff]   ;;  %v5994_v34 = vld [vmem:[%s6319_s6 + $0xc28] ss:$48 sps:$4 sm:$0xff]  }
 0x214   : > { %4193 = vmatprep.subr.bf16.mxu0 %v5927_v35  ;;  %4316 = vmatprep.subr.bf16.mxu1 %v5930_v36  ;;  %v5999_v35 = vld [vmem:[%s6319_s6 + $0xc84] ss:$48 sps:$4 sm:$0xff]   ;;  %v6002_v36 = vld [vmem:[%s6319_s6 + $0xc8c] ss:$48 sps:$4 sm:$0xff]  }
 0x217   : > { %4194 = vmatpush1.bf16.msra.mxu0 %v5925_v40  ;;  %4317 = vmatpush1.bf16.msra.mxu1 %v5928_v41  ;;  %v5997_v40 = vld [vmem:[%s6319_s6 + $0xc80] ss:$48 sps:$4 sm:$0xff]   ;;  %v6000_v41 = vld [vmem:[%s6319_s6 + $0xc88] ss:$48 sps:$4 sm:$0xff]  }
 0x218   : > { %4195 = vmatprep.subr.bf16.mxu0 %v5933_v44  ;;  %4318 = vmatprep.subr.bf16.mxu1 %v5936_v51  ;;  %v6005_v44 = vld [vmem:[%s6319_s6 + $0xce4] ss:$48 sps:$4 sm:$0xff]   ;;  %v6008_v51 = vld [vmem:[%s6319_s6 + $0xcec] ss:$48 sps:$4 sm:$0xff]  }
 0x21b   : > { %4196 = vmatpush1.bf16.msra.mxu0 %v5931_v45  ;;  %4319 = vmatpush1.bf16.msra.mxu1 %v5934_v46  ;;  %v6006_v45 = vld [vmem:[%s6319_s6 + $0xce8] ss:$48 sps:$4 sm:$0xff]   ;;  %v6011_v46 = vld [vmem:[%s6319_s6 + $0xd44] ss:$48 sps:$4 sm:$0xff]  }
 0x21c   : > { %4197 = vmatprep.subr.bf16.mxu0 %v5939_v47  ;;  %4320 = vmatprep.subr.bf16.mxu1 %v5942_v49  ;;  %v6014_v47 = vld [vmem:[%s6319_s6 + $0xd4c] ss:$48 sps:$4 sm:$0xff]   ;;  %v6009_v49 = vld [vmem:[%s6319_s6 + $0xd40] ss:$48 sps:$4 sm:$0xff]  }
 0x21f   : > { %4198 = vmatpush1.bf16.msra.mxu0 %v5937_v50  ;;  %4321 = vmatpush1.bf16.msra.mxu1 %v5940_v52  ;;  %v6012_v50 = vld [vmem:[%s6319_s6 + $0xd48] ss:$48 sps:$4 sm:$0xff]   ;;  %v6020_v52 = vld [vmem:[%s6319_s6 + $0xdac] ss:$48 sps:$4 sm:$0xff]  }
 0x220   : > { %4199 = vmatprep.subr.bf16.mxu0 %v5945_v53  ;;  %4322 = vmatprep.subr.bf16.mxu1 %v5948_v54  ;;  %v6015_v53 = vld [vmem:[%s6319_s6 + $0xda0] ss:$48 sps:$4 sm:$0xff]   ;;  %v6018_v54 = vld [vmem:[%s6319_s6 + $0xda8] ss:$48 sps:$4 sm:$0xff]  }
 0x223   : > { %4200 = vmatpush1.bf16.msra.mxu0 %v5943_v55  ;;  %4323 = vmatpush1.bf16.msra.mxu1 %v5946_v56  ;;  %v6023_v55 = vld [vmem:[%s6319_s6 + $0xe04] ss:$48 sps:$4 sm:$0xff]   ;;  %v6026_v56 = vld [vmem:[%s6319_s6 + $0xe0c] ss:$48 sps:$4 sm:$0xff]  }
 0x224   : > { %4201 = vmatprep.subr.bf16.mxu0 %v5951_v58  ;;  %4324 = vmatprep.subr.bf16.mxu1 %v5954_v60  ;;  %v6021_v58 = vld [vmem:[%s6319_s6 + $0xe00] ss:$48 sps:$4 sm:$0xff]   ;;  %v6024_v60 = vld [vmem:[%s6319_s6 + $0xe08] ss:$48 sps:$4 sm:$0xff]  }
 0x227   : > { %4202 = vmatpush1.bf16.msra.mxu0 %v5949_v61  ;;  %4325 = vmatpush1.bf16.msra.mxu1 %v5952_v62  ;;  %v6029_v61 = vld [vmem:[%s6319_s6 + $0xe64] ss:$48 sps:$4 sm:$0xff]   ;;  %v6032_v62 = vld [vmem:[%s6319_s6 + $0xe6c] ss:$48 sps:$4 sm:$0xff]  }
 0x228   : > { %4203 = vmatprep.subr.bf16.mxu0 %v5957_v63  ;;  %4326 = vmatprep.subr.bf16.mxu1 %v5960_v0  ;;  %v6027_v63 = vld [vmem:[%s6319_s6 + $0xe60] ss:$48 sps:$4 sm:$0xff]   ;;  %v6030_v0 = vld [vmem:[%s6319_s6 + $0xe68] ss:$48 sps:$4 sm:$0xff]  }
 0x22b   : > { %4204 = vmatpush1.bf16.msra.mxu0 %v5955_v1  ;;  %4327 = vmatpush1.bf16.msra.mxu1 %v5958_v3  ;;  %v6035_v1 = vld [vmem:[%s6319_s6 + $0xec4] ss:$48 sps:$4 sm:$0xff]   ;;  %v6038_v3 = vld [vmem:[%s6319_s6 + $0xecc] ss:$48 sps:$4 sm:$0xff]  }
 0x22c   : > { %4205 = vmatprep.subr.bf16.mxu0 %v5963_v4  ;;  %4328 = vmatprep.subr.bf16.mxu1 %v5966_v5  ;;  %v6033_v4 = vld [vmem:[%s6319_s6 + $0xec0] ss:$48 sps:$4 sm:$0xff]   ;;  %v6036_v5 = vld [vmem:[%s6319_s6 + $0xec8] ss:$48 sps:$4 sm:$0xff]  }
 0x22f   : > { %4206 = vmatpush1.bf16.msra.mxu0 %v5961_v7  ;;  %4329 = vmatpush1.bf16.msra.mxu1 %v5964_v8  ;;  %v6041_v7 = vld [vmem:[%s6319_s6 + $0xf24] ss:$48 sps:$4 sm:$0xff]   ;;  %v6044_v8 = vld [vmem:[%s6319_s6 + $0xf2c] ss:$48 sps:$4 sm:$0xff]  }
 0x230   : > { %4207 = vmatprep.subr.bf16.mxu0 %v5969_v9  ;;  %4330 = vmatprep.subr.bf16.mxu1 %v5972_v10  ;;  %v6039_v9 = vld [vmem:[%s6319_s6 + $0xf20] ss:$48 sps:$4 sm:$0xff]   ;;  %v6042_v10 = vld [vmem:[%s6319_s6 + $0xf28] ss:$48 sps:$4 sm:$0xff]  }
 0x233   : > { %4208 = vmatpush1.bf16.msra.mxu0 %v5967_v11  ;;  %4331 = vmatpush1.bf16.msra.mxu1 %v5970_v12  ;;  %v6047_v11 = vld [vmem:[%s6319_s6 + $0xf84] ss:$48 sps:$4 sm:$0xff]   ;;  %v6050_v12 = vld [vmem:[%s6319_s6 + $0xf8c] ss:$48 sps:$4 sm:$0xff]  }
 0x234   : > { %4209 = vmatprep.subr.bf16.mxu0 %v5975_v13  ;;  %4332 = vmatprep.subr.bf16.mxu1 %v5978_v16  ;;  %v6045_v13 = vld [vmem:[%s6319_s6 + $0xf80] ss:$48 sps:$4 sm:$0xff]   ;;  %v6048_v16 = vld [vmem:[%s6319_s6 + $0xf88] ss:$48 sps:$4 sm:$0xff]  }
 0x237   : > { %4210 = vmatpush1.bf16.msra.mxu0 %v5973_v17  ;;  %4333 = vmatpush1.bf16.msra.mxu1 %v5976_v19  ;;  %v6053_v17 = vld [vmem:[%s6319_s6 + $0xfe4] ss:$48 sps:$4 sm:$0xff]   ;;  %v6056_v19 = vld [vmem:[%s6319_s6 + $0xfec] ss:$48 sps:$4 sm:$0xff]  }
 0x238   : > { %4211 = vmatprep.subr.bf16.mxu0 %v5981_v20  ;;  %4334 = vmatprep.subr.bf16.mxu1 %v5984_v23  ;;  %v6051_v20 = vld [vmem:[%s6319_s6 + $0xfe0] ss:$48 sps:$4 sm:$0xff]   ;;  %v6054_v23 = vld [vmem:[%s6319_s6 + $0xfe8] ss:$48 sps:$4 sm:$0xff]  }
 0x23b   : > { %4212 = vmatpush1.bf16.msra.mxu0 %v5979_v14  ;;  %4335 = vmatpush1.bf16.msra.mxu1 %v5982_v24  ;;  %v6059_v14 = vld [vmem:[%s6319_s6 + $0x1044] ss:$48 sps:$4 sm:$0xff]   ;;  %v6062_v24 = vld [vmem:[%s6319_s6 + $0x104c] ss:$48 sps:$4 sm:$0xff]  }
 0x23c   : > { %4213 = vmatprep.subr.bf16.mxu0 %v5987_v25  ;;  %4336 = vmatprep.subr.bf16.mxu1 %v5990_v26  ;;  %v6057_v25 = vld [vmem:[%s6319_s6 + $0x1040] ss:$48 sps:$4 sm:$0xff]   ;;  %v6060_v26 = vld [vmem:[%s6319_s6 + $0x1048] ss:$48 sps:$4 sm:$0xff]  }
 0x23f   : > { %4214 = vmatpush1.bf16.msra.mxu0 %v5985_v28  ;;  %4337 = vmatpush1.bf16.msra.mxu1 %v5988_v30  ;;  %v6065_v28 = vld [vmem:[%s6319_s6 + $0x10a4] ss:$48 sps:$4 sm:$0xff]   ;;  %v6068_v30 = vld [vmem:[%s6319_s6 + $0x10ac] ss:$48 sps:$4 sm:$0xff]  }
 0x240   : > { %4224 = vmatprep.subr.bf16.mxu0 %v5993_v18  ;;  %4347 = vmatprep.subr.bf16.mxu1 %v5996_v31  ;;  %v813_v18 = vld [vmem:[%s6319_s6 + $0x1100] sm:$0xff]  ;;  %v814_v31 = vld [vmem:[%s6319_s6 + $0x1108] sm:$0xff] }
 0x242   : > { %4216 = vmatmul.mubr.bf16.vlgmr.msra.gmra.mrb[8].mxu0 %v6506_v29  ;;  %4339 = vmatmul.mubr.bf16.vlgmr.msra.gmra.mrb[8].mxu1 %v6506_v29  ;;  %v6003_v29 = vld [vmem:[%s6319_s6 + $0xce0] ss:$48 sps:$4 sm:$0xff]  }
 0x243   : > { %4225 = vmatpush1.bf16.msra.mxu0 %v5991_v32  ;;  %4348 = vmatpush1.bf16.msra.mxu1 %v5994_v34  ;;  %v6063_v32 = vld [vmem:[%s6319_s6 + $0x10a0] ss:$48 sps:$4 sm:$0xff]   ;;  %v6066_v34 = vld [vmem:[%s6319_s6 + $0x10a8] ss:$48 sps:$4 sm:$0xff]  }
 0x244   : > { %4226 = vmatprep.subr.bf16.mxu0 %v5999_v35  ;;  %4349 = vmatprep.subr.bf16.mxu1 %v6002_v36  ;;  %v5121_v35 = vcombine.high %v813_v18, %v813_v18  ;;  %v5123_v36 = vcombine.high %v814_v31, %v814_v31 }
 0x245   : > { %5133 = vmatprep.mubr.msk.bf16.mxu0 %vm3609_vm0, %v6511_v33  ;;  %5135 = vmatprep.mubr.msk.bf16.mxu1 %vm3609_vm0, %v6511_v33  ;;  %v6017_v33 = vld [vmem:[%s6319_s6 + $0xda4] ss:$48 sps:$4 sm:$0xff]  }
 0x247   : > { %4227 = vmatpush1.bf16.msra.mxu0 %v5997_v40  ;;  %4350 = vmatpush1.bf16.msra.mxu1 %v6000_v41  ;;  %v5120_v40 = vcombine.low %v813_v18, %v813_v18  ;;  %v5122_v41 = vcombine.low %v814_v31, %v814_v31 }
 0x248   : > { %4228 = vmatprep.subr.bf16.mxu0 %v6005_v44  ;;  %4351 = vmatprep.subr.bf16.mxu1 %v6008_v51 }
 0x249   : > { %v3639_v44 = vsel %vm3613_vm1, %v5120_v40, 0  ;;  %v3645_v51 = vsel %vm3613_vm1, %v5122_v41, 0 }
 0x24b   : > { %4229 = vmatpush1.bf16.msra.mxu0 %v6003_v29  ;;  %4352 = vmatpush1.bf16.msra.mxu1 %v6006_v45  ;;  %v3575_v29 = vsub.s32 6, %v6374_v43  ;;  %v3579_v45 = vsub.s32 7, %v6374_v43 }
 0x24c   : > { %4230 = vmatprep.subr.bf16.mxu0 %v6011_v46  ;;  %4353 = vmatprep.subr.bf16.mxu1 %v6014_v47  ;;  %v3568_v46 = vrot.slane %v6810_v59, %v251_v27 }
 0x24d   : > { %v3576_v47 = vrot.slane %v6810_v59, %v3575_v29 }
 0x24f   : > { %4231 = vmatpush1.bf16.msra.mxu0 %v6009_v49  ;;  %4354 = vmatpush1.bf16.msra.mxu1 %v6012_v50  ;;  %v3572_v49 = vrot.slane %v6810_v59, %v255_v21  ;;  %v3580_v50 = vrot.slane %v6810_v59, %v3579_v45 }
 0x250   : > { %4232 = vmatprep.subr.bf16.mxu0 %v6017_v33  ;;  %4355 = vmatprep.subr.bf16.mxu1 %v6020_v52 }
 0x253   : > { %4233 = vmatpush1.bf16.msra.mxu0 %v6015_v53  ;;  %4356 = vmatpush1.bf16.msra.mxu1 %v6018_v54 }
 0x254   : > { %4234 = vmatprep.subr.bf16.mxu0 %v6023_v55  ;;  %4357 = vmatprep.subr.bf16.mxu1 %v6026_v56 }
 0x257   : > { %4235 = vmatpush1.bf16.msra.mxu0 %v6021_v58  ;;  %4358 = vmatpush1.bf16.msra.mxu1 %v6024_v60 }
 0x258   : > { %4236 = vmatprep.subr.bf16.mxu0 %v6029_v61  ;;  %4359 = vmatprep.subr.bf16.mxu1 %v6032_v62 }
 0x25b   : > { %4237 = vmatpush1.bf16.msra.mxu0 %v6027_v63  ;;  %4360 = vmatpush1.bf16.msra.mxu1 %v6030_v0 }
 0x25c   : > { %4238 = vmatprep.subr.bf16.mxu0 %v6035_v1  ;;  %4361 = vmatprep.subr.bf16.mxu1 %v6038_v3  ;;  %v4440_v1 = vrot.slane %v4432_v57, %v6827_v22 }
 0x25f   : > { %4239 = vmatpush1.bf16.msra.mxu0 %v6033_v4  ;;  %4362 = vmatpush1.bf16.msra.mxu1 %v6036_v5  ;;  %v816_v5 = vld [vmem:[%s6325_s30 + $0x8] sm:$0xf] }
 0x260   : > { %4240 = vmatprep.subr.bf16.mxu0 %v6041_v7  ;;  %4363 = vmatprep.subr.bf16.mxu1 %v6044_v8  ;;  %v3584_v7 = vrot.slane %v816_v5, %v6408_v2  ;;  %v3592_v8 = vrot.slane %v816_v5, %v6489_v15 }
 0x263   : > { %4241 = vmatpush1.bf16.msra.mxu0 %v6039_v9  ;;  %4364 = vmatpush1.bf16.msra.mxu1 %v6042_v10  ;;  %v3588_v9 = vrot.slane %v816_v5, %v6381_v48  ;;  %v3596_v10 = vrot.slane %v816_v5, %v6414_v6 }
 0x264   : > { %4242 = vmatprep.subr.bf16.mxu0 %v6047_v11  ;;  %4365 = vmatprep.subr.bf16.mxu1 %v6050_v12 }
 0x267   : > { %4243 = vmatpush1.bf16.msra.mxu0 %v6045_v13  ;;  %4366 = vmatpush1.bf16.msra.mxu1 %v6048_v16 }
 0x268   : > { %4244 = vmatprep.subr.bf16.mxu0 %v6053_v17  ;;  %4367 = vmatprep.subr.bf16.mxu1 %v6056_v19 }
 0x26b   : > { %4245 = vmatpush1.bf16.msra.mxu0 %v6051_v20  ;;  %4368 = vmatpush1.bf16.msra.mxu1 %v6054_v23 }
 0x26c   : > { %4246 = vmatprep.subr.bf16.mxu0 %v6059_v14  ;;  %4369 = vmatprep.subr.bf16.mxu1 %v6062_v24 }
 0x26f   : > { %4247 = vmatpush1.bf16.msra.mxu0 %v6057_v25  ;;  %4370 = vmatpush1.bf16.msra.mxu1 %v6060_v26 }
 0x270   : > { %4248 = vmatprep.subr.bf16.mxu0 %v6065_v28  ;;  %4371 = vmatprep.subr.bf16.mxu1 %v6068_v30 }
 0x273   : > { %4249 = vmatpush1.bf16.msra.mxu0 %v6063_v32  ;;  %4372 = vmatpush1.bf16.msra.mxu1 %v6066_v34 }
 0x274   : > { %5132 = vmatprep.subr.msk.bf16.mxu0 %vm3613_vm1, %v5121_v35  ;;  %5134 = vmatprep.subr.msk.bf16.mxu1 %vm3613_vm1, %v5123_v36 }
 0x277   : > { %4251 = vmatpush1.bf16.msra.mxu0 %v3639_v44  ;;  %4374 = vmatpush1.bf16.msra.mxu1 %v3645_v51 }
 0x27a   : > { %4257 = vmatmul.mubr.bf16.vlgmr.msra.gmra.mrb[8].mxu0 %v6577_v42  ;;  %4380 = vmatmul.mubr.bf16.vlgmr.msra.gmra.mrb[8].mxu1 %v6577_v42 }
 0x295   : > { %v4012_v33 = vpop.f32.mrb[4].mxu0  ;;  %v4135_v42 = vpop.f32.mrb[4].mxu1 }
 0x296   : > { %v5143_v52 = vadd.f32 %v4012_v33, %v3568_v46  ;;  %v5145_v53 = vadd.f32 %v4135_v42, %v3576_v47  ;;  %v4014_v54 = vpop.f32.mrb[5].mxu0  ;;  %v4137_v55 = vpop.f32.mrb[5].mxu1 }
 0x297   : > { %v5144_v56 = vadd.f32 %v4014_v54, %v3572_v49  ;;  %v5146_v58 = vadd.f32 %v4137_v55, %v3580_v50  ;;  %v4016_v60 = vpop.f32.mrb[6].mxu0  ;;  %v4139_v27 = vpop.f32.mrb[6].mxu1 }
 0x298   : > { %v4017_v61 = vpop.f32.mrb[7].mxu0  ;;  %v4140_v43 = vpop.f32.mrb[7].mxu1 }
 0x299   : > { %v4402_v62 = vcombine.low %v5143_v52, %v5144_v56  ;;  %v4403_v21 = vcombine.low %v5145_v53, %v5146_v58 }
 0x29b   : > { %v4424_v59 = vrot.slane %v4402_v62, %v6827_v22  ;;  %v4431_v63 = vrot.slane %v4403_v21, %v6827_v22 }
 0x29d   : > { %v4433_v0 = vcombine.low %v4424_v59, %v4431_v63 }
 0x29f   : > { %v4447_v3 = vrot.slane %v4433_v0, %v6827_v22 }
 0x2a1   : > { %v4448_v4 = vcombine.low %v4440_v1, %v4447_v3 }
 0x2a3   : > { %4475 = vst [vmem:[%s227_s9] sm:$0xff] %v4448_v4 }
 0x34d   : > { %v4258_v11 = vpop.f32.mrb[8].mxu0  ;;  %v4381_v37 = vpop.f32.mrb[8].mxu1 }
 0x34e   : > { %v5147_v39 = vadd.f32 %v4258_v11, %v3584_v7  ;;  %v5149_v57 = vadd.f32 %v4381_v37, %v3592_v8  ;;  %v4260_v12 = vpop.f32.mrb[9].mxu0  ;;  %v4383_v13 = vpop.f32.mrb[9].mxu1 }
 0x34f   : > { %v5148_v16 = vadd.f32 %v4260_v12, %v3588_v9  ;;  %v5150_v17 = vadd.f32 %v4383_v13, %v3596_v10  ;;  %v4262_v19 = vpop.f32.mrb[10].mxu0  ;;  %v4385_v20 = vpop.f32.mrb[10].mxu1 }
 0x350   : > { %v4263_v23 = vpop.f32.mrb[11].mxu0  ;;  %v4386_v14 = vpop.f32.mrb[11].mxu1 }
 0x351   : > { %v4449_v24 = vcombine.low %v5147_v39, %v5148_v16  ;;  %v4450_v2 = vcombine.low %v5149_v57, %v5150_v17 }
 0x353   : > { %v4457_v15 = vrot.slane %v4449_v24, %v6827_v22  ;;  %v4464_v48 = vrot.slane %v4450_v2, %v6827_v22 }
 0x355   : > { %v4465_v25 = vcombine.low %v4457_v15, %v4464_v48 }
 0x357   : > { %v4472_v6 = vrot.slane %v4465_v25, %v6827_v22 }
 0x359   : > { %4480 = vst.msk [vmem:[%s227_s9 + $0x8] sm:$0xf] %vm4478_vm2, %v4472_v6 }
 0x35a PF: > { %p16_p8 = scmp.ge.s32.totalorder %s6218_s17, 4   ;;  %s7056_s12 = smov %s6163_s13 }
 0x35b   : > { %s7057_s13 = smov %s6167_s14  ;;  %s7058_s14 = smov %s6228_s20 }
 0x35c   : > { %s7059_s15 = smov %s6218_s17  ;;  %18 = sbr.rel (!%p16_p8) target bundleno = 5 (0x5), region = 85 }
 0x363   :  { %4501 = vsyncpa [#allocation3], 1 }
 0x364   :  { %4503 = vsyncpa [#allocation3 + $0x1], 1 }
 0x365   :  { %4504 = vsyncpa [#allocation5], 1 }
 0x366   :  { %4506 = vsyncpa [#allocation5 + $0x1], 1 }

</bundles_post_ra>
